<compile_context>
chip_gen: v7x
topology: tpu7x:2x2x1
jax: 0.10.0
libtpu: 0.0.40
codegen_flags: <defaults>
</compile_context>

<pallas_src>
import functools

import jax
import jax.numpy as jnp
from jax.experimental import pallas as pl
from jax.experimental.pallas import tpu as pltpu

LANES = 128  # lane-dense width for the logits / probs slabs


def _round_up(n, m):
    return ((n + m - 1) // m) * m


def mlp_logits_kernel(x_ref, w1_ref, b1_ref, w2_ref, b2_ref, w3_ref, b3_ref,
                      logits_ref, m_part_ref, l_part_ref, *, tile_b, batch):
    """Per-tile MLP -> lane-dense logits + per-tile dim=0 softmax partial stats."""
    x = x_ref[...]                                   # [tb, 4]   f32
    w1 = w1_ref[...]                                 # [4, 128]  f32

    # fc1 on the VPU: K=4 contraction as 4 broadcast FMAs (keeps the MXU free).
    acc = x[:, 0:1] * w1[0:1, :]
    for k in range(1, 4):
        acc = acc + x[:, k:k + 1] * w1[k:k + 1, :]
    h1 = jnp.maximum(acc + b1_ref[...], 0.0)         # [tb, 128] f32

    # fc2 on the MXU: bf16 operands, f32 accumulation; bias/ReLU stay f32.
    h2 = jnp.dot(h1.astype(jnp.bfloat16), w2_ref[...],
                 preferred_element_type=jnp.float32)
    h2 = jnp.maximum(h2 + b2_ref[...], 0.0)          # [tb, 128] f32

    # fc3 on the MXU with zero-padded [128, 128] weights -> lane-dense result/stores.
    logits = jnp.dot(h2.astype(jnp.bfloat16), w3_ref[...],
                     preferred_element_type=jnp.float32) + b3_ref[...]
    logits_ref[...] = logits                         # [tb, 128] f32

    # Per-tile column stats for the dim=0 (batch) softmax; mask padded batch rows.
    row = (pl.program_id(0) * tile_b
           + jax.lax.broadcasted_iota(jnp.int32, (tile_b, LANES), 0))
    valid = row < batch
    tile_m = jnp.max(jnp.where(valid, logits, -jnp.inf), axis=0, keepdims=True)
    tile_l = jnp.sum(jnp.where(valid, jnp.exp(logits - tile_m), 0.0),
                     axis=0, keepdims=True)
    m_part_ref[...] = jnp.broadcast_to(tile_m, (8, LANES))
    l_part_ref[...] = jnp.broadcast_to(tile_l, (8, LANES))


def softmax_normalize_kernel(logits_ref, m_ref, l_ref, o_ref):
    """probs = exp(logits - m) * (1/l), columnwise dim=0 softmax, lane-dense store."""
    inv = pl.reciprocal(l_ref[...], approx=True)     # EUP slot -> effectively free
    o_ref[...] = jnp.exp(logits_ref[...] - m_ref[...]) * inv


def policy_net_forward(x, params, *, tile_b=256):
    """x: [B, 4] float32; params store Linear weights as [in, out], biases as [1, out]."""
    B = x.shape[0]
    tb = min(tile_b, _round_up(max(B, 1), 8))
    num_tiles = -(-B // tb)
    bp = num_tiles * tb

    x_p = jnp.zeros((bp, 4), jnp.float32).at[:B].set(x.astype(jnp.float32))

    w1 = params["w1"].astype(jnp.float32)                       # VPU path, keep f32
    b1 = params["b1"].reshape(1, LANES).astype(jnp.float32)
    w2 = params["w2"].astype(jnp.bfloat16)                      # MXU operand
    b2 = params["b2"].reshape(1, LANES).astype(jnp.float32)
    w3 = jnp.zeros((LANES, LANES), jnp.bfloat16).at[:, :2].set(
        params["w3"].astype(jnp.bfloat16))                      # lane-dense fc3
    b3 = jnp.zeros((1, LANES), jnp.float32).at[:, :2].set(
        params["b3"].reshape(1, 2).astype(jnp.float32))

    def const_spec(shape):
        return pl.BlockSpec(shape, lambda i, _n=len(shape): (0,) * _n)

    parallel = pltpu.CompilerParams(dimension_semantics=("parallel",))

    logits, m_parts, l_parts = pl.pallas_call(
        functools.partial(mlp_logits_kernel, tile_b=tb, batch=B),
        grid=(num_tiles,),
        in_specs=[
            pl.BlockSpec((tb, 4), lambda i: (i, 0)),
            const_spec((4, LANES)), const_spec((1, LANES)),
            const_spec((LANES, LANES)), const_spec((1, LANES)),
            const_spec((LANES, LANES)), const_spec((1, LANES)),
        ],
        out_specs=(
            pl.BlockSpec((tb, LANES), lambda i: (i, 0)),
            pl.BlockSpec((8, LANES), lambda i: (i, 0)),
            pl.BlockSpec((8, LANES), lambda i: (i, 0)),
        ),
        out_shape=(
            jax.ShapeDtypeStruct((bp, LANES), jnp.float32),
            jax.ShapeDtypeStruct((num_tiles * 8, LANES), jnp.float32),
            jax.ShapeDtypeStruct((num_tiles * 8, LANES), jnp.float32),
        ),
        compiler_params=parallel,
    )(x_p, w1, b1, w2, b2, w3, b3)

    # Tiny cross-tile combine of per-column (dim=0) running max / sum-exp.
    m_t = m_parts.reshape(num_tiles, 8, LANES)[:, 0, :]         # [T, 128]
    l_t = l_parts.reshape(num_tiles, 8, LANES)[:, 0, :]
    gm = jnp.max(m_t, axis=0, keepdims=True)                    # [1, 128]
    gl = jnp.sum(l_t * jnp.exp(m_t - gm), axis=0, keepdims=True)

    probs = pl.pallas_call(
        softmax_normalize_kernel,
        grid=(num_tiles,),
        in_specs=[
            pl.BlockSpec((tb, LANES), lambda i: (i, 0)),
            const_spec((1, LANES)), const_spec((1, LANES)),
        ],
        out_specs=pl.BlockSpec((tb, LANES), lambda i: (i, 0)),
        out_shape=jax.ShapeDtypeStruct((bp, LANES), jnp.float32),
        compiler_params=parallel,
    )(logits, gm, gl)

    return probs[:B, :2]


def init_params(key):
    """Deterministic init matching nn.Linear shapes, stored as [in, out] / [1, out]."""
    def linear(key, fan_in, fan_out):
        kw, kb = jax.random.split(key)
        bound = 1.0 / jnp.sqrt(float(fan_in))
        w = jax.random.uniform(kw, (fan_in, fan_out), jnp.float32, -bound, bound)
        b = jax.random.uniform(kb, (1, fan_out), jnp.float32, -bound, bound)
        return w, b

    k1, k2, k3 = jax.random.split(key, 3)
    w1, b1 = linear(k1, 4, 128)
    w2, b2 = linear(k2, 128, 128)
    w3, b3 = linear(k3, 128, 2)
    return {"w1": w1, "b1": b1, "w2": w2, "b2": b2, "w3": w3, "b3": b3}


def reference_forward(x, p):
    """Pure-f32 reference matching the torch module's forward (softmax over dim=0)."""
    h1 = jnp.maximum(x @ p["w1"] + p["b1"], 0.0)
    h2 = jnp.maximum(h1 @ p["w2"] + p["b2"], 0.0)
    logits = h2 @ p["w3"] + p["b3"]
    return jax.nn.softmax(logits, axis=0)


if __name__ == "__main__":
    key = jax.random.PRNGKey(0)
    kx, kp = jax.random.split(key)
    params = init_params(kp)

    forward = jax.jit(policy_net_forward)

    for B in (512, 300):   # 300 exercises the padded/masked (ragged) last tile
        x = jax.random.normal(jax.random.fold_in(kx, B), (B, 4), dtype=jnp.float32)
        out = jax.block_until_ready(forward(x, params))
        ref = reference_forward(x, params)

        assert out.shape == (B, 2)
        # bf16 MXU operands + approx reciprocal -> loose-but-meaningful tolerances
        assert jnp.allclose(out, ref, rtol=5e-2, atol=5e-4), f"mismatch at B={B}"
        # columns of a dim=0 softmax each sum to ~1 (approx reciprocal slack)
        assert jnp.allclose(jnp.sum(out, axis=0), jnp.ones((2,)), atol=2e-2), \
            f"column sums off at B={B}"

    print("KERNEL_OK")
</pallas_src>

<mosaic_0001>
module attributes {stable_mosaic.version = 11 : i64} {
  func.func @mlp_logits_kernel(%arg0: i32, %arg1: memref<256x4xf32, #tpu.memory_space<vmem>>, %arg2: memref<4x128xf32, #tpu.memory_space<vmem>>, %arg3: memref<1x128xf32, #tpu.memory_space<vmem>>, %arg4: memref<128x128xbf16, #tpu.memory_space<vmem>>, %arg5: memref<1x128xf32, #tpu.memory_space<vmem>>, %arg6: memref<128x128xbf16, #tpu.memory_space<vmem>>, %arg7: memref<1x128xf32, #tpu.memory_space<vmem>>, %arg8: memref<256x128xf32, #tpu.memory_space<vmem>>, %arg9: memref<8x128xf32, #tpu.memory_space<vmem>>, %arg10: memref<8x128xf32, #tpu.memory_space<vmem>>) attributes {dimension_semantics = [#tpu.dimension_semantics<parallel>], iteration_bounds = array<i64: 2>, scalar_prefetch = 0 : i64, scratch_operands = 0 : i64, tpu.core_type = #tpu.core_type<tc>, window_params = [{transform_indices = @transform_0, window_bounds = array<i64: 256, 4>}, {pipeline_mode = #tpu.pipeline_mode<synchronous>, transform_indices = @transform_1, window_bounds = array<i64: 4, 128>}, {pipeline_mode = #tpu.pipeline_mode<synchronous>, transform_indices = @transform_2, window_bounds = array<i64: 1, 128>}, {pipeline_mode = #tpu.pipeline_mode<synchronous>, transform_indices = @transform_3, window_bounds = array<i64: 128, 128>}, {pipeline_mode = #tpu.pipeline_mode<synchronous>, transform_indices = @transform_4, window_bounds = array<i64: 1, 128>}, {pipeline_mode = #tpu.pipeline_mode<synchronous>, transform_indices = @transform_5, window_bounds = array<i64: 128, 128>}, {pipeline_mode = #tpu.pipeline_mode<synchronous>, transform_indices = @transform_6, window_bounds = array<i64: 1, 128>}, {transform_indices = @transform_7, window_bounds = array<i64: 256, 128>}, {transform_indices = @transform_8, window_bounds = array<i64: 8, 128>}, {transform_indices = @transform_9, window_bounds = array<i64: 8, 128>}]} {
    %c0 = arith.constant 0 : index
    %c0_0 = arith.constant 0 : index
    %0 = vector.load %arg1[%c0, %c0_0] : memref<256x4xf32, #tpu.memory_space<vmem>>, vector<256x4xf32>
    %c0_1 = arith.constant 0 : index
    %c0_2 = arith.constant 0 : index
    %1 = vector.load %arg2[%c0_1, %c0_2] : memref<4x128xf32, #tpu.memory_space<vmem>>, vector<4x128xf32>
    %2 = vector.extract_strided_slice %0 {offsets = [0, 0], sizes = [256, 1], strides = [1, 1]} : vector<256x4xf32> to vector<256x1xf32>
    %3 = vector.extract_strided_slice %1 {offsets = [0, 0], sizes = [1, 128], strides = [1, 1]} : vector<4x128xf32> to vector<1x128xf32>
    %4 = vector.broadcast %2 : vector<256x1xf32> to vector<256x128xf32>
    %5 = vector.broadcast %3 : vector<1x128xf32> to vector<256x128xf32>
    %6 = arith.mulf %4, %5 : vector<256x128xf32>
    %7 = vector.extract_strided_slice %0 {offsets = [0, 1], sizes = [256, 1], strides = [1, 1]} : vector<256x4xf32> to vector<256x1xf32>
    %8 = vector.extract_strided_slice %1 {offsets = [1, 0], sizes = [1, 128], strides = [1, 1]} : vector<4x128xf32> to vector<1x128xf32>
    %9 = vector.broadcast %7 : vector<256x1xf32> to vector<256x128xf32>
    %10 = vector.broadcast %8 : vector<1x128xf32> to vector<256x128xf32>
    %11 = arith.mulf %9, %10 : vector<256x128xf32>
    %12 = arith.addf %6, %11 : vector<256x128xf32>
    %13 = vector.extract_strided_slice %0 {offsets = [0, 2], sizes = [256, 1], strides = [1, 1]} : vector<256x4xf32> to vector<256x1xf32>
    %14 = vector.extract_strided_slice %1 {offsets = [2, 0], sizes = [1, 128], strides = [1, 1]} : vector<4x128xf32> to vector<1x128xf32>
    %15 = vector.broadcast %13 : vector<256x1xf32> to vector<256x128xf32>
    %16 = vector.broadcast %14 : vector<1x128xf32> to vector<256x128xf32>
    %17 = arith.mulf %15, %16 : vector<256x128xf32>
    %18 = arith.addf %12, %17 : vector<256x128xf32>
    %19 = vector.extract_strided_slice %0 {offsets = [0, 3], sizes = [256, 1], strides = [1, 1]} : vector<256x4xf32> to vector<256x1xf32>
    %20 = vector.extract_strided_slice %1 {offsets = [3, 0], sizes = [1, 128], strides = [1, 1]} : vector<4x128xf32> to vector<1x128xf32>
    %21 = vector.broadcast %19 : vector<256x1xf32> to vector<256x128xf32>
    %22 = vector.broadcast %20 : vector<1x128xf32> to vector<256x128xf32>
    %23 = arith.mulf %21, %22 : vector<256x128xf32>
    %24 = arith.addf %18, %23 : vector<256x128xf32>
    %c0_3 = arith.constant 0 : index
    %c0_4 = arith.constant 0 : index
    %25 = vector.load %arg3[%c0_3, %c0_4] : memref<1x128xf32, #tpu.memory_space<vmem>>, vector<1x128xf32>
    %26 = vector.broadcast %25 : vector<1x128xf32> to vector<256x128xf32>
    %27 = arith.addf %24, %26 : vector<256x128xf32>
    %cst = arith.constant 0.000000e+00 : f32
    %28 = vector.broadcast %cst : f32 to vector<256x128xf32>
    %29 = arith.maximumf %27, %28 : vector<256x128xf32>
    %30 = arith.truncf %29 : vector<256x128xf32> to vector<256x128xbf16>
    %c0_5 = arith.constant 0 : index
    %c0_6 = arith.constant 0 : index
    %31 = vector.load %arg4[%c0_5, %c0_6] : memref<128x128xbf16, #tpu.memory_space<vmem>>, vector<128x128xbf16>
    %cst_7 = arith.constant dense<0.000000e+00> : vector<256x128xf32>
    %32 = tpu.matmul %30, %31, %cst_7 {dimension_numbers = #tpu.dot_dimension_numbers<[1], [0], [0], [1], [0, 0, 1, 1], [], []>} : vector<256x128xbf16>, vector<128x128xbf16>, vector<256x128xf32> -> vector<256x128xf32>
    %c0_8 = arith.constant 0 : index
    %c0_9 = arith.constant 0 : index
    %33 = vector.load %arg5[%c0_8, %c0_9] : memref<1x128xf32, #tpu.memory_space<vmem>>, vector<1x128xf32>
    %34 = vector.broadcast %33 : vector<1x128xf32> to vector<256x128xf32>
    %35 = arith.addf %32, %34 : vector<256x128xf32>
    %cst_10 = arith.constant 0.000000e+00 : f32
    %36 = vector.broadcast %cst_10 : f32 to vector<256x128xf32>
    %37 = arith.maximumf %35, %36 : vector<256x128xf32>
    %38 = arith.truncf %37 : vector<256x128xf32> to vector<256x128xbf16>
    %c0_11 = arith.constant 0 : index
    %c0_12 = arith.constant 0 : index
    %39 = vector.load %arg6[%c0_11, %c0_12] : memref<128x128xbf16, #tpu.memory_space<vmem>>, vector<128x128xbf16>
    %cst_13 = arith.constant dense<0.000000e+00> : vector<256x128xf32>
    %40 = tpu.matmul %38, %39, %cst_13 {dimension_numbers = #tpu.dot_dimension_numbers<[1], [0], [0], [1], [0, 0, 1, 1], [], []>} : vector<256x128xbf16>, vector<128x128xbf16>, vector<256x128xf32> -> vector<256x128xf32>
    %c0_14 = arith.constant 0 : index
    %c0_15 = arith.constant 0 : index
    %41 = vector.load %arg7[%c0_14, %c0_15] : memref<1x128xf32, #tpu.memory_space<vmem>>, vector<1x128xf32>
    %42 = vector.broadcast %41 : vector<1x128xf32> to vector<256x128xf32>
    %43 = arith.addf %40, %42 : vector<256x128xf32>
    %c0_16 = arith.constant 0 : index
    %c0_17 = arith.constant 0 : index
    %44 = vector.load %arg8[%c0_16, %c0_17] : memref<256x128xf32, #tpu.memory_space<vmem>>, vector<256x128xf32>
    tpu.vector_store %arg8[%c0_16, %c0_17], %43 {strides = array<i32>} : memref<256x128xf32, #tpu.memory_space<vmem>>, vector<256x128xf32>,
    %c256_i32 = arith.constant 256 : i32
    %45 = arith.muli %arg0, %c256_i32 : i32
    %46 = tpu.iota {dimensions = array<i32: 0>} : vector<256x128xi32>
    %47 = vector.broadcast %45 : i32 to vector<256x128xi32>
    %48 = arith.addi %47, %46 : vector<256x128xi32>
    %c512_i32 = arith.constant 512 : i32
    %49 = vector.broadcast %c512_i32 : i32 to vector<256x128xi32>
    %50 = arith.cmpi slt, %48, %49 : vector<256x128xi32>
    %cst_18 = arith.constant 0xFF800000 : f32
    %51 = vector.broadcast %cst_18 : f32 to vector<256x128xf32>
    %52 = arith.select %50, %43, %51 : vector<256x128xi1>, vector<256x128xf32>
    %cst_19 = arith.constant dense<0xFF800000> : vector<128xf32>
    %53 = vector.multi_reduction <maximumf>, %52, %cst_19 [0] : vector<256x128xf32> to vector<128xf32>
    %54 = vector.shape_cast %53 : vector<128xf32> to vector<1x128xf32>
    %55 = vector.broadcast %54 : vector<1x128xf32> to vector<256x128xf32>
    %56 = arith.subf %43, %55 : vector<256x128xf32>
    %57 = math.exp %56 : vector<256x128xf32>
    %cst_20 = arith.constant 0.000000e+00 : f32
    %58 = vector.broadcast %cst_20 : f32 to vector<256x128xf32>
    %59 = arith.select %50, %57, %58 : vector<256x128xi1>, vector<256x128xf32>
    %cst_21 = arith.constant dense<0.000000e+00> : vector<128xf32>
    %60 = vector.multi_reduction <add>, %59, %cst_21 [0] : vector<256x128xf32> to vector<128xf32>
    %61 = vector.shape_cast %60 : vector<128xf32> to vector<1x128xf32>
    %62 = vector.shape_cast %54 : vector<1x128xf32> to vector<1x128xf32>
    %63 = vector.broadcast %62 : vector<1x128xf32> to vector<8x128xf32>
    %c0_22 = arith.constant 0 : index
    %c0_23 = arith.constant 0 : index
    %64 = vector.load %arg9[%c0_22, %c0_23] : memref<8x128xf32, #tpu.memory_space<vmem>>, vector<8x128xf32>
    tpu.vector_store %arg9[%c0_22, %c0_23], %63 {strides = array<i32>} : memref<8x128xf32, #tpu.memory_space<vmem>>, vector<8x128xf32>,
    %65 = vector.shape_cast %61 : vector<1x128xf32> to vector<1x128xf32>
    %66 = vector.broadcast %65 : vector<1x128xf32> to vector<8x128xf32>
    %c0_24 = arith.constant 0 : index
    %c0_25 = arith.constant 0 : index
    %67 = vector.load %arg10[%c0_24, %c0_25] : memref<8x128xf32, #tpu.memory_space<vmem>>, vector<8x128xf32>
    tpu.vector_store %arg10[%c0_24, %c0_25], %66 {strides = array<i32>} : memref<8x128xf32, #tpu.memory_space<vmem>>, vector<8x128xf32>,
    return
  }
  func.func @transform_0(%arg0: i32) -> (i32, i32) {
    %c0_i32 = arith.constant 0 : i32
    %c0_i32_0 = arith.constant 0 : i32
    return %arg0, %c0_i32 : i32, i32
  }
  func.func @transform_1(%arg0: i32) -> (i32, i32) {
    %c0_i32 = arith.constant 0 : i32
    %c0_i32_0 = arith.constant 0 : i32
    %c0_i32_1 = arith.constant 0 : i32
    return %c0_i32, %c0_i32_0 : i32, i32
  }
  func.func @transform_2(%arg0: i32) -> (i32, i32) {
    %c0_i32 = arith.constant 0 : i32
    %c0_i32_0 = arith.constant 0 : i32
    %c0_i32_1 = arith.constant 0 : i32
    return %c0_i32, %c0_i32_0 : i32, i32
  }
  func.func @transform_3(%arg0: i32) -> (i32, i32) {
    %c0_i32 = arith.constant 0 : i32
    %c0_i32_0 = arith.constant 0 : i32
    %c0_i32_1 = arith.constant 0 : i32
    return %c0_i32, %c0_i32_0 : i32, i32
  }
  func.func @transform_4(%arg0: i32) -> (i32, i32) {
    %c0_i32 = arith.constant 0 : i32
    %c0_i32_0 = arith.constant 0 : i32
    %c0_i32_1 = arith.constant 0 : i32
    return %c0_i32, %c0_i32_0 : i32, i32
  }
  func.func @transform_5(%arg0: i32) -> (i32, i32) {
    %c0_i32 = arith.constant 0 : i32
    %c0_i32_0 = arith.constant 0 : i32
    %c0_i32_1 = arith.constant 0 : i32
    return %c0_i32, %c0_i32_0 : i32, i32
  }
  func.func @transform_6(%arg0: i32) -> (i32, i32) {
    %c0_i32 = arith.constant 0 : i32
    %c0_i32_0 = arith.constant 0 : i32
    %c0_i32_1 = arith.constant 0 : i32
    return %c0_i32, %c0_i32_0 : i32, i32
  }
  func.func @transform_7(%arg0: i32) -> (i32, i32) {
    %c0_i32 = arith.constant 0 : i32
    %c0_i32_0 = arith.constant 0 : i32
    return %arg0, %c0_i32 : i32, i32
  }
  func.func @transform_8(%arg0: i32) -> (i32, i32) {
    %c0_i32 = arith.constant 0 : i32
    %c0_i32_0 = arith.constant 0 : i32
    return %arg0, %c0_i32 : i32, i32
  }
  func.func @transform_9(%arg0: i32) -> (i32, i32) {
    %c0_i32 = arith.constant 0 : i32
    %c0_i32_0 = arith.constant 0 : i32
    return %arg0, %c0_i32 : i32, i32
  }
}

module attributes {stable_mosaic.version = 11 : i64} {
  func.func @softmax_normalize_kernel(%arg0: i32, %arg1: memref<256x128xf32, #tpu.memory_space<vmem>>, %arg2: memref<1x128xf32, #tpu.memory_space<vmem>>, %arg3: memref<1x128xf32, #tpu.memory_space<vmem>>, %arg4: memref<256x128xf32, #tpu.memory_space<vmem>>) attributes {dimension_semantics = [#tpu.dimension_semantics<parallel>], iteration_bounds = array<i64: 2>, scalar_prefetch = 0 : i64, scratch_operands = 0 : i64, tpu.core_type = #tpu.core_type<tc>, window_params = [{transform_indices = @transform_0, window_bounds = array<i64: 256, 128>}, {pipeline_mode = #tpu.pipeline_mode<synchronous>, transform_indices = @transform_1, window_bounds = array<i64: 1, 128>}, {pipeline_mode = #tpu.pipeline_mode<synchronous>, transform_indices = @transform_2, window_bounds = array<i64: 1, 128>}, {transform_indices = @transform_3, window_bounds = array<i64: 256, 128>}]} {
    %c0 = arith.constant 0 : index
    %c0_0 = arith.constant 0 : index
    %0 = vector.load %arg3[%c0, %c0_0] : memref<1x128xf32, #tpu.memory_space<vmem>>, vector<1x128xf32>
    %1 = tpu.reciprocal %0 {approx = true} : vector<1x128xf32> -> vector<1x128xf32>
    %c0_1 = arith.constant 0 : index
    %c0_2 = arith.constant 0 : index
    %2 = vector.load %arg1[%c0_1, %c0_2] : memref<256x128xf32, #tpu.memory_space<vmem>>, vector<256x128xf32>
    %c0_3 = arith.constant 0 : index
    %c0_4 = arith.constant 0 : index
    %3 = vector.load %arg2[%c0_3, %c0_4] : memref<1x128xf32, #tpu.memory_space<vmem>>, vector<1x128xf32>
    %4 = vector.broadcast %3 : vector<1x128xf32> to vector<256x128xf32>
    %5 = arith.subf %2, %4 : vector<256x128xf32>
    %6 = math.exp %5 : vector<256x128xf32>
    %7 = vector.broadcast %1 : vector<1x128xf32> to vector<256x128xf32>
    %8 = arith.mulf %6, %7 : vector<256x128xf32>
    %c0_5 = arith.constant 0 : index
    %c0_6 = arith.constant 0 : index
    %9 = vector.load %arg4[%c0_5, %c0_6] : memref<256x128xf32, #tpu.memory_space<vmem>>, vector<256x128xf32>
    tpu.vector_store %arg4[%c0_5, %c0_6], %8 {strides = array<i32>} : memref<256x128xf32, #tpu.memory_space<vmem>>, vector<256x128xf32>,
    return
  }
  func.func @transform_0(%arg0: i32) -> (i32, i32) {
    %c0_i32 = arith.constant 0 : i32
    %c0_i32_0 = arith.constant 0 : i32
    return %arg0, %c0_i32 : i32, i32
  }
  func.func @transform_1(%arg0: i32) -> (i32, i32) {
    %c0_i32 = arith.constant 0 : i32
    %c0_i32_0 = arith.constant 0 : i32
    %c0_i32_1 = arith.constant 0 : i32
    return %c0_i32, %c0_i32_0 : i32, i32
  }
  func.func @transform_2(%arg0: i32) -> (i32, i32) {
    %c0_i32 = arith.constant 0 : i32
    %c0_i32_0 = arith.constant 0 : i32
    %c0_i32_1 = arith.constant 0 : i32
    return %c0_i32, %c0_i32_0 : i32, i32
  }
  func.func @transform_3(%arg0: i32) -> (i32, i32) {
    %c0_i32 = arith.constant 0 : i32
    %c0_i32_0 = arith.constant 0 : i32
    return %arg0, %c0_i32 : i32, i32
  }
}

</mosaic_0001>

<bundles_post_ra>
// kernel: policy_net_forward.3
= control target key start
LH: loop header
LB: loop body
LE: loop exit
PB: predicated region body
PF: predicated region fallthrough
CT: control target
= control target key end

     0   :  { %s551_s12 = smov 0   ;;  %s717_s0 = inlined_call_operand.vmem [shape: f32[512,128], index: 0, kind: input, shape index: {}]   ;;  %s718_s1 = inlined_call_operand.vmem [shape: f32[1,128], index: 1, kind: input, shape index: {}]   ;;  %s719_s2 = inlined_call_operand.vmem [shape: f32[1,128], index: 2, kind: input, shape index: {}]   ;;  %s720_s3 = inlined_call_operand.vmem [shape: f32[512,128], index: 3, kind: output, shape index: {}]  }
   0x1 LB: > { %s437_s13 = sadd.s32 4294967295, %s529_s12   ;;  %p441_p0 = scmp.ge.s32.totalorder %s529_s12, 1  ;;  %s529_s12 = sphi %s551_s12, %s13_s12  }
   0x2   : > { %p138_p1 = scmp.lt.s32.totalorder %s529_s12, 3 }
   0x4   : > { %p139_p2 = pnand %p441_p0, %p138_p1 }
   0x5   : > { %s442_s14 = sshll.u32 (!%p139_p2), %s437_s13, 5  ;;  %v174_v0 = vld [vmem:[%s719_s2] sm:$0x1] (!%p139_p2)  ;;  %v312_v3 = vlaneseq (!%p139_p2) }
   0x6   : > { %142 = sbr.rel (%p139_p2) target bundleno = 66 (0x42), region = 32  ;;  %p163_p3 = scmp.lt.s32.totalorder (!%p139_p2), %s442_s14, 63  ;;  %v568_v1 = vld [vmem:[%s718_s1] ss:$0 sm:$0xff] (!%p139_p2)  ;;  %457 = vrcp.f32 (!%p139_p2), %v174_v0 }
   0x7   : > { %v313_v22 = vshrl.u32 (!%p139_p2), %v312_v3, 7 }
   0x9   : > { %v314_v36 = vsub.s32 (!%p139_p2), 0, %v313_v22 }
   0xd   : > { %s722_s14 = smov (!%p163_p3, %s442_s14), 63 }
   0xe   : > { %s443_s17 = sshll.u32 %s722_s14, 3 }
   0xf   : > { %s575_s22 = scalar_lea.vmem %s717_s0, %s443_s17  ;;  %s623_s25 = scalar_lea.vmem %s720_s3, %s443_s17 }
  0x10   : > { %v176_v2 = vld [vmem:[%s575_s22] sm:$0xff]  ;;  %v177_v4 = vld [vmem:[%s575_s22 + $0x8] sm:$0xff]  ;;  %v178_v5 = vld [vmem:[%s575_s22 + $0x10] sm:$0xff]  ;;  %v458_v40 = vpop.eup %457 }
  0x11   : > { %v215_v6 = vsub.f32 %v176_v2, %v568_v1  ;;  %v216_v7 = vsub.f32 %v177_v4, %v568_v1  ;;  %v217_v8 = vsub.f32 %v178_v5, %v568_v1  ;;  %v179_v9 = vld [vmem:[%s575_s22 + $0x18] sm:$0xff]  ;;  %v180_v10 = vld [vmem:[%s575_s22 + $0x20] sm:$0xff]  ;;  %v181_v11 = vld [vmem:[%s575_s22 + $0x28] sm:$0xff]  ;;  %v610_v50 = vrot.slane %v458_v40, %v314_v36 }
  0x12   : > { %v218_v12 = vsub.f32 %v179_v9, %v568_v1  ;;  %v219_v13 = vsub.f32 %v180_v10, %v568_v1  ;;  %v220_v14 = vsub.f32 %v181_v11, %v568_v1  ;;  %v182_v15 = vld [vmem:[%s575_s22 + $0x30] sm:$0xff]  ;;  %v183_v16 = vld [vmem:[%s575_s22 + $0x38] sm:$0xff]  ;;  %v184_v17 = vld [vmem:[%s575_s22 + $0x40] sm:$0xff] }
  0x13   : > { %v247_v18 = vmul.f32 1.442695, %v215_v6  ;;  %v249_v19 = vmul.f32 1.442695, %v216_v7  ;;  %v251_v20 = vmul.f32 1.442695, %v217_v8  ;;  %v221_v21 = vsub.f32 %v182_v15, %v568_v1 }
  0x14   : > { %v253_v23 = vmul.f32 1.442695, %v218_v12  ;;  %v222_v24 = vsub.f32 %v183_v16, %v568_v1  ;;  %v255_v25 = vmul.f32 1.442695, %v219_v13  ;;  %v223_v26 = vsub.f32 %v184_v17, %v568_v1  ;;  %v185_v27 = vld [vmem:[%s575_s22 + $0x48] sm:$0xff]  ;;  %v186_v28 = vld [vmem:[%s575_s22 + $0x50] sm:$0xff] }
  0x15   : > { %459 = vpow2.f32 %v247_v18  ;;  %v187_v29 = vld [vmem:[%s575_s22 + $0x58] sm:$0xff]  ;;  %v257_v30 = vmul.f32 1.442695, %v220_v14  ;;  %v224_v31 = vsub.f32 %v185_v27, %v568_v1  ;;  %v188_v32 = vld [vmem:[%s575_s22 + $0x60] sm:$0xff]  ;;  %v259_v33 = vmul.f32 1.442695, %v221_v21 }
  0x16   : > { %461 = vpow2.f32 %v249_v19  ;;  %v225_v34 = vsub.f32 %v186_v28, %v568_v1  ;;  %v189_v35 = vld [vmem:[%s575_s22 + $0x68] sm:$0xff]  ;;  %v261_v37 = vmul.f32 1.442695, %v222_v24  ;;  %v226_v38 = vsub.f32 %v187_v29, %v568_v1  ;;  %v190_v39 = vld [vmem:[%s575_s22 + $0x70] sm:$0xff]  ;;  %v191_v43 = vld [vmem:[%s575_s22 + $0x78] sm:$0xff] }
  0x17   : > { %463 = vpow2.f32 %v251_v20  ;;  %v263_v41 = vmul.f32 1.442695, %v223_v26  ;;  %v227_v42 = vsub.f32 %v188_v32, %v568_v1  ;;  %v265_v44 = vmul.f32 1.442695, %v224_v31  ;;  %v192_v46 = vld [vmem:[%s575_s22 + $0x80] sm:$0xff]  ;;  %v193_v49 = vld [vmem:[%s575_s22 + $0x88] sm:$0xff] }
  0x18   : > { %465 = vpow2.f32 %v253_v23  ;;  %v228_v45 = vsub.f32 %v189_v35, %v568_v1  ;;  %v267_v47 = vmul.f32 1.442695, %v225_v34  ;;  %v229_v48 = vsub.f32 %v190_v39, %v568_v1  ;;  %v194_v53 = vld [vmem:[%s575_s22 + $0x90] sm:$0xff]  ;;  %v195_v56 = vld [vmem:[%s575_s22 + $0x98] sm:$0xff]  ;;  %v196_v59 = vld [vmem:[%s575_s22 + $0xa0] sm:$0xff] }
  0x19   : > { %467 = vpow2.f32 %v255_v25  ;;  %v269_v51 = vmul.f32 1.442695, %v226_v38  ;;  %v230_v52 = vsub.f32 %v191_v43, %v568_v1  ;;  %v271_v54 = vmul.f32 1.442695, %v227_v42  ;;  %v197_v63 = vld [vmem:[%s575_s22 + $0xa8] sm:$0xff]  ;;  %v198_v5 = vld [vmem:[%s575_s22 + $0xb0] sm:$0xff] }
  0x1a   : > { %469 = vpow2.f32 %v257_v30  ;;  %v231_v55 = vsub.f32 %v192_v46, %v568_v1  ;;  %v273_v57 = vmul.f32 1.442695, %v228_v45  ;;  %v232_v58 = vsub.f32 %v193_v49, %v568_v1  ;;  %v199_v10 = vld [vmem:[%s575_s22 + $0xb8] sm:$0xff]  ;;  %v200_v15 = vld [vmem:[%s575_s22 + $0xc0] sm:$0xff]  ;;  %v201_v20 = vld [vmem:[%s575_s22 + $0xc8] sm:$0xff] }
  0x1b   : > { %471 = vpow2.f32 %v259_v33  ;;  %v275_v61 = vmul.f32 1.442695, %v229_v48  ;;  %v233_v62 = vsub.f32 %v194_v53, %v568_v1  ;;  %v277_v3 = vmul.f32 1.442695, %v230_v52  ;;  %v202_v25 = vld [vmem:[%s575_s22 + $0xd0] sm:$0xff]  ;;  %v203_v30 = vld [vmem:[%s575_s22 + $0xd8] sm:$0xff] }
  0x1c   : > { %473 = vpow2.f32 %v261_v37  ;;  %v234_v4 = vsub.f32 %v195_v56, %v568_v1  ;;  %v279_v8 = vmul.f32 1.442695, %v231_v55  ;;  %v235_v9 = vsub.f32 %v196_v59, %v568_v1  ;;  %v204_v35 = vld [vmem:[%s575_s22 + $0xe0] sm:$0xff]  ;;  %v205_v40 = vld [vmem:[%s575_s22 + $0xe8] sm:$0xff]  ;;  %v206_v45 = vld [vmem:[%s575_s22 + $0xf0] sm:$0xff] }
  0x1d   : > { %475 = vpow2.f32 %v263_v41  ;;  %v281_v13 = vmul.f32 1.442695, %v232_v58  ;;  %v236_v14 = vsub.f32 %v197_v63, %v568_v1  ;;  %v283_v18 = vmul.f32 1.442695, %v233_v62 }
  0x1e   : > { %477 = vpow2.f32 %v265_v44  ;;  %v237_v19 = vsub.f32 %v198_v5, %v568_v1  ;;  %v285_v23 = vmul.f32 1.442695, %v234_v4  ;;  %v238_v24 = vsub.f32 %v199_v10, %v568_v1 }
  0x1f   : > { %v460_v60 = vpop.eup %459  ;;  %479 = vpow2.f32 %v267_v47  ;;  %v287_v28 = vmul.f32 1.442695, %v235_v9  ;;  %v239_v29 = vsub.f32 %v200_v15, %v568_v1  ;;  %v289_v33 = vmul.f32 1.442695, %v236_v14 }
  0x20   : > { %v462_v0 = vpop.eup %461  ;;  %v317_v2 = vmul.f32 %v460_v60, %v610_v50  ;;  %481 = vpow2.f32 %v269_v51  ;;  %v240_v34 = vsub.f32 %v201_v20, %v568_v1  ;;  %v291_v38 = vmul.f32 1.442695, %v237_v19  ;;  %v207_v51 = vld [vmem:[%s575_s22 + $0xf8] sm:$0xff] }
  0x21   : > { %v464_v6 = vpop.eup %463  ;;  %v318_v7 = vmul.f32 %v462_v0, %v610_v50  ;;  %483 = vpow2.f32 %v271_v54  ;;  %v241_v39 = vsub.f32 %v202_v25, %v568_v1  ;;  %v293_v43 = vmul.f32 1.442695, %v238_v24 }
  0x22   : > { %v466_v11 = vpop.eup %465  ;;  %349 = vst [vmem:[%s623_s25] sm:$0xff] %v317_v2  ;;  %v319_v12 = vmul.f32 %v464_v6, %v610_v50  ;;  %485 = vpow2.f32 %v273_v57  ;;  %v242_v44 = vsub.f32 %v203_v30, %v568_v1  ;;  %v295_v48 = vmul.f32 1.442695, %v239_v29 }
  0x23   : > { %v468_v16 = vpop.eup %467  ;;  %350 = vst [vmem:[%s623_s25 + $0x8] sm:$0xff] %v318_v7  ;;  %v320_v17 = vmul.f32 %v466_v11, %v610_v50  ;;  %487 = vpow2.f32 %v275_v61  ;;  %v243_v49 = vsub.f32 %v204_v35, %v568_v1  ;;  %v297_v54 = vmul.f32 1.442695, %v240_v34 }
  0x24   : > { %v470_v21 = vpop.eup %469  ;;  %351 = vst [vmem:[%s623_s25 + $0x10] sm:$0xff] %v319_v12  ;;  %v321_v22 = vmul.f32 %v468_v16, %v610_v50  ;;  %489 = vpow2.f32 %v277_v3  ;;  %v244_v55 = vsub.f32 %v205_v40, %v568_v1  ;;  %v299_v58 = vmul.f32 1.442695, %v241_v39 }
  0x25   : > { %v472_v26 = vpop.eup %471  ;;  %352 = vst [vmem:[%s623_s25 + $0x18] sm:$0xff] %v320_v17  ;;  %v322_v27 = vmul.f32 %v470_v21, %v610_v50  ;;  %491 = vpow2.f32 %v279_v8  ;;  %v245_v59 = vsub.f32 %v206_v45, %v568_v1  ;;  %v301_v62 = vmul.f32 1.442695, %v242_v44 }
  0x26   : > { %v474_v31 = vpop.eup %473  ;;  %353 = vst [vmem:[%s623_s25 + $0x20] sm:$0xff] %v321_v22  ;;  %v323_v32 = vmul.f32 %v472_v26, %v610_v50  ;;  %493 = vpow2.f32 %v281_v13  ;;  %v246_v63 = vsub.f32 %v207_v51, %v568_v1  ;;  %v303_v3 = vmul.f32 1.442695, %v243_v49 }
  0x27   : > { %v476_v36 = vpop.eup %475  ;;  %354 = vst [vmem:[%s623_s25 + $0x28] sm:$0xff] %v322_v27  ;;  %v324_v37 = vmul.f32 %v474_v31, %v610_v50  ;;  %495 = vpow2.f32 %v283_v18  ;;  %v305_v6 = vmul.f32 1.442695, %v244_v55  ;;  %v307_v1 = vmul.f32 1.442695, %v245_v59 }
  0x28   : > { %v478_v41 = vpop.eup %477  ;;  %355 = vst [vmem:[%s623_s25 + $0x30] sm:$0xff] %v323_v32  ;;  %v325_v42 = vmul.f32 %v476_v36, %v610_v50  ;;  %497 = vpow2.f32 %v285_v23  ;;  %v309_v11 = vmul.f32 1.442695, %v246_v63 }
  0x29   : > { %v480_v46 = vpop.eup %479  ;;  %356 = vst [vmem:[%s623_s25 + $0x38] sm:$0xff] %v324_v37  ;;  %v326_v47 = vmul.f32 %v478_v41, %v610_v50  ;;  %499 = vpow2.f32 %v287_v28 }
  0x2a   : > { %v482_v52 = vpop.eup %481  ;;  %357 = vst [vmem:[%s623_s25 + $0x40] sm:$0xff] %v325_v42  ;;  %v327_v53 = vmul.f32 %v480_v46, %v610_v50  ;;  %501 = vpow2.f32 %v289_v33 }
  0x2b   : > { %v484_v56 = vpop.eup %483  ;;  %358 = vst [vmem:[%s623_s25 + $0x48] sm:$0xff] %v326_v47  ;;  %v328_v57 = vmul.f32 %v482_v52, %v610_v50  ;;  %503 = vpow2.f32 %v291_v38 }
  0x2c   : > { %v486_v60 = vpop.eup %485  ;;  %359 = vst [vmem:[%s623_s25 + $0x50] sm:$0xff] %v327_v53  ;;  %v329_v61 = vmul.f32 %v484_v56, %v610_v50  ;;  %505 = vpow2.f32 %v293_v43 }
  0x2d   : > { %v488_v0 = vpop.eup %487  ;;  %360 = vst [vmem:[%s623_s25 + $0x58] sm:$0xff] %v328_v57  ;;  %v330_v2 = vmul.f32 %v486_v60, %v610_v50  ;;  %507 = vpow2.f32 %v295_v48 }
  0x2e   : > { %v490_v4 = vpop.eup %489  ;;  %361 = vst [vmem:[%s623_s25 + $0x60] sm:$0xff] %v329_v61  ;;  %v331_v5 = vmul.f32 %v488_v0, %v610_v50  ;;  %509 = vpow2.f32 %v297_v54 }
  0x2f   : > { %v492_v7 = vpop.eup %491  ;;  %362 = vst [vmem:[%s623_s25 + $0x68] sm:$0xff] %v330_v2  ;;  %v332_v8 = vmul.f32 %v490_v4, %v610_v50  ;;  %511 = vpow2.f32 %v299_v58 }
  0x30   : > { %v494_v9 = vpop.eup %493  ;;  %363 = vst [vmem:[%s623_s25 + $0x70] sm:$0xff] %v331_v5  ;;  %v333_v10 = vmul.f32 %v492_v7, %v610_v50  ;;  %513 = vpow2.f32 %v301_v62 }
  0x31   : > { %v496_v12 = vpop.eup %495  ;;  %364 = vst [vmem:[%s623_s25 + $0x78] sm:$0xff] %v332_v8  ;;  %v334_v13 = vmul.f32 %v494_v9, %v610_v50  ;;  %515 = vpow2.f32 %v303_v3 }
  0x32   : > { %v498_v14 = vpop.eup %497  ;;  %365 = vst [vmem:[%s623_s25 + $0x80] sm:$0xff] %v333_v10  ;;  %v335_v15 = vmul.f32 %v496_v12, %v610_v50  ;;  %517 = vpow2.f32 %v305_v6 }
  0x33   : > { %v500_v16 = vpop.eup %499  ;;  %366 = vst [vmem:[%s623_s25 + $0x88] sm:$0xff] %v334_v13  ;;  %v336_v17 = vmul.f32 %v498_v14, %v610_v50  ;;  %519 = vpow2.f32 %v307_v1 }
  0x34   : > { %v502_v18 = vpop.eup %501  ;;  %367 = vst [vmem:[%s623_s25 + $0x90] sm:$0xff] %v335_v15  ;;  %v337_v19 = vmul.f32 %v500_v16, %v610_v50  ;;  %521 = vpow2.f32 %v309_v11 }
  0x35   : > { %v504_v20 = vpop.eup %503  ;;  %368 = vst [vmem:[%s623_s25 + $0x98] sm:$0xff] %v336_v17  ;;  %v338_v21 = vmul.f32 %v502_v18, %v610_v50 }
  0x36   : > { %v506_v22 = vpop.eup %505  ;;  %369 = vst [vmem:[%s623_s25 + $0xa0] sm:$0xff] %v337_v19  ;;  %v339_v23 = vmul.f32 %v504_v20, %v610_v50 }
  0x37   : > { %v508_v24 = vpop.eup %507  ;;  %370 = vst [vmem:[%s623_s25 + $0xa8] sm:$0xff] %v338_v21  ;;  %v340_v25 = vmul.f32 %v506_v22, %v610_v50 }
  0x38   : > { %v510_v26 = vpop.eup %509  ;;  %371 = vst [vmem:[%s623_s25 + $0xb0] sm:$0xff] %v339_v23  ;;  %v341_v27 = vmul.f32 %v508_v24, %v610_v50 }
  0x39   : > { %v512_v28 = vpop.eup %511  ;;  %372 = vst [vmem:[%s623_s25 + $0xb8] sm:$0xff] %v340_v25  ;;  %v342_v29 = vmul.f32 %v510_v26, %v610_v50 }
  0x3a   : > { %v514_v30 = vpop.eup %513  ;;  %373 = vst [vmem:[%s623_s25 + $0xc0] sm:$0xff] %v341_v27  ;;  %v343_v31 = vmul.f32 %v512_v28, %v610_v50 }
  0x3b   : > { %v516_v32 = vpop.eup %515  ;;  %374 = vst [vmem:[%s623_s25 + $0xc8] sm:$0xff] %v342_v29  ;;  %v344_v33 = vmul.f32 %v514_v30, %v610_v50 }
  0x3c   : > { %v518_v34 = vpop.eup %517  ;;  %375 = vst [vmem:[%s623_s25 + $0xd0] sm:$0xff] %v343_v31  ;;  %v345_v35 = vmul.f32 %v516_v32, %v610_v50 }
  0x3d   : > { %v520_v36 = vpop.eup %519  ;;  %376 = vst [vmem:[%s623_s25 + $0xd8] sm:$0xff] %v344_v33  ;;  %v346_v37 = vmul.f32 %v518_v34, %v610_v50 }
  0x3e   : > { %v522_v38 = vpop.eup %521  ;;  %377 = vst [vmem:[%s623_s25 + $0xe0] sm:$0xff] %v345_v35  ;;  %v347_v39 = vmul.f32 %v520_v36, %v610_v50 }
  0x3f   : > { %378 = vst [vmem:[%s623_s25 + $0xe8] sm:$0xff] %v346_v37  ;;  %v348_v40 = vmul.f32 %v522_v38, %v610_v50 }
  0x40   : > { %379 = vst [vmem:[%s623_s25 + $0xf0] sm:$0xff] %v347_v39 }
  0x41   : > { %380 = vst [vmem:[%s623_s25 + $0xf8] sm:$0xff] %v348_v40 }
  0x42 PF: > { %s13_s12 = sadd.s32 1, %s529_s12  }
  0x43   : > { %p10_p4 = scmp.ge.s32.totalorder %s13_s12, 4  }
  0x45   :  { %12 = sbr.rel (!%p10_p4) target bundleno = 1 (0x1), region = 62 }

// kernel: policy_net_forward.2
= control target key start
LH: loop header
LB: loop body
LE: loop exit
PB: predicated region body
PF: predicated region fallthrough
CT: control target
= control target key end

     0   :  { %s2641_s30 = smov 0   ;;  %s3958_s0 = inlined_call_operand.vmem [shape: f32[512,4], index: 0, kind: input, shape index: {}]   ;;  %s3959_s1 = inlined_call_operand.vmem [shape: f32[4,128], index: 1, kind: input, shape index: {}]   ;;  %s3960_s2 = inlined_call_operand.vmem [shape: f32[1,128], index: 2, kind: input, shape index: {}]   ;;  %s3961_s3 = inlined_call_operand.vmem [shape: bf16[128,128], index: 3, kind: input, shape index: {}]   ;;  %s3962_s4 = inlined_call_operand.vmem [shape: f32[1,128], index: 4, kind: input, shape index: {}]   ;;  %s3963_s5 = inlined_call_operand.vmem [shape: bf16[128,128], index: 5, kind: input, shape index: {}]   ;;  %s3964_s6 = inlined_call_operand.vmem [shape: f32[1,128], index: 6, kind: input, shape index: {}]   ;;  %s3965_s7 = inlined_call_operand.vmem [shape: f32[512,128], index: 7, kind: output, shape index: {0}]   ;;  %s3966_s8 = inlined_call_operand.vmem [shape: f32[16,128], index: 8, kind: output, shape index: {1}]   ;;  %s3967_s9 = inlined_call_operand.vmem [shape: f32[16,128], index: 9, kind: output, shape index: {2}]  }
   0x1 LB: > { %s2647_s10 = sadd.s32 4294967295, %s2585_s30   ;;  %p2263_p0 = scmp.ge.s32.totalorder %s2585_s30, 1  ;;  %s2585_s30 = sphi %s2641_s30, %s20_s30  }
   0x2   : > { %p293_p1 = scmp.lt.s32.totalorder %s2585_s30, 3 }
   0x4   : > { %p294_p2 = pnand %p2263_p0, %p293_p1 }
   0x6   : > { %297 = sbr.rel (%p294_p2) target bundleno = 1066 (0x42a), region = 48 }
   0xd   : > { %s2264_s11 = sshll.u32 %s2647_s10, 5  ;;  %v3970_v0 = vmov 1   ;;  %v3968_v1 = vmov 0   ;;  %v3974_v9 = vmov 2   ;;  %v3972_v13 = vmov 3   ;;  %v2499_v26 = vld [vmem:[%s3961_s3] sm:$0xff]  }
   0xe   : > { %2449 = vset.pattern.permute.xlu1 %v3970_v0  ;;  %2448 = vset.pattern.permute.xlu0 %v3968_v1  ;;  %p338_p3 = scmp.lt.s32.totalorder %s2264_s11, 63  ;;  %v2500_v27 = vld [vmem:[%s3961_s3 + $0x8] sm:$0xff]   ;;  %v2501_v28 = vld [vmem:[%s3961_s3 + $0x10] sm:$0xff]   ;;  %v2502_v31 = vld [vmem:[%s3961_s3 + $0x18] sm:$0xff]   ;;  %p349_p4 = scmp.lt.s32.totalorder %s2647_s10, 1 }
   0xf   : > { %2340 = vmatprep.subr.bf16.mxu0 %v2499_v26  ;;  %v2503_v35 = vld [vmem:[%s3961_s3 + $0x20] sm:$0xff]   ;;  %v2504_v37 = vld [vmem:[%s3961_s3 + $0x28] sm:$0xff]   ;;  %v2505_v40 = vld [vmem:[%s3961_s3 + $0x30] sm:$0xff]  }
  0x10   : > { %s4115_s11 = smov (!%p338_p3, %s2264_s11), 63  ;;  %2341 = vmatpush3.bf16.msra.mxu0 %v2499_v26  ;;  %v2506_v43 = vld [vmem:[%s3961_s3 + $0x38] sm:$0xff]  }
  0x11   : > { %s2265_s12 = sshll.u32 %s4115_s11, 3  ;;  %2342 = vmatprep.subr.bf16.mxu0 %v2500_v27  ;;  %s2289_s11 = sshll.u32 %s2647_s10, 8 }
  0x12   : > { %s2662_s15 = scalar_lea.vmem %s3958_s0, %s2265_s12  ;;  %s3375_s24 = scalar_lea.vmem %s3965_s7, %s2265_s12 }
  0x13   : > { %v2665_v2 = vld [vmem:[%s2662_s15] sm:$0xff]  ;;  %v2670_v3 = vld [vmem:[%s2662_s15 + $0x8] sm:$0xff]  ;;  %v360_v4 = vld [vmem:[%s2662_s15 + $0x10] sm:$0xff]  ;;  %s4117_s10 = smov (!%p349_p4, %s2647_s10), 1 }
  0x14   : > { %588 = vperm.xlu1 %2449, %v2665_v2   ;;  %393 = vperm.xlu0 %2448, %v2665_v2   ;;  %v2676_v5 = vld [vmem:[%s2662_s15 + $0x18] sm:$0xff]  ;;  %v2679_v6 = vld [vmem:[%s2662_s15 + $0x28] sm:$0xff]  ;;  %v364_v7 = vld [vmem:[%s2662_s15 + $0x30] sm:$0xff]  ;;  %s2268_s12 = sshll.u32 %s4117_s10, 3 }
  0x15   : > { %v2688_v8 = vld [vmem:[%s2662_s15 + $0x48] sm:$0xff]  ;;  %v2694_v10 = vld [vmem:[%s2662_s15 + $0x50] sm:$0xff]  ;;  %v2716_v16 = vld [vmem:[%s2662_s15 + $0x20] sm:$0xff]  ;;  %2343 = vmatpush3.bf16.msra.mxu0 %v2500_v27  ;;  %s352_s27 = scalar_lea.vmem %s3966_s8, %s2268_s12  ;;  %s356_s13 = scalar_lea.vmem %s3967_s9, %s2268_s12 }
  0x16   : > { %v2698_v11 = vld [vmem:[%s2662_s15 + $0x68] sm:$0xff]  ;;  %v2703_v12 = vld [vmem:[%s2662_s15 + $0x70] sm:$0xff]  ;;  %v2737_v20 = vld [vmem:[%s2662_s15 + $0x38] sm:$0xff]  ;;  %2344 = vmatprep.subr.bf16.mxu0 %v2501_v28 }
  0x17   : > { %v2709_v14 = vld [vmem:[%s2662_s15 + $0x88] sm:$0xff]  ;;  %v2713_v15 = vld [vmem:[%s2662_s15 + $0x90] sm:$0xff]  ;;  %v2764_v24 = vld [vmem:[%s2662_s15 + $0x40] sm:$0xff] }
  0x18   : > { %592 = vperm.xlu1 %2449, %v2670_v3   ;;  %398 = vperm.xlu0 %2448, %v2670_v3   ;;  %v2722_v17 = vld [vmem:[%s2662_s15 + $0xa8] sm:$0xff]  ;;  %v2727_v18 = vld [vmem:[%s2662_s15 + $0xb0] sm:$0xff]  ;;  %v2776_v25 = vld [vmem:[%s2662_s15 + $0x58] sm:$0xff] }
  0x19   : > { %v2732_v19 = vld [vmem:[%s2662_s15 + $0xc8] sm:$0xff]  ;;  %v2740_v21 = vld [vmem:[%s2662_s15 + $0xd0] sm:$0xff]  ;;  %2345 = vmatpush3.bf16.msra.mxu0 %v2501_v28  ;;  %v370_v32 = vld [vmem:[%s2662_s15 + $0x60] sm:$0xff] }
  0x1a   : > { %v2746_v22 = vld [vmem:[%s2662_s15 + $0xe8] sm:$0xff]  ;;  %v2752_v23 = vld [vmem:[%s2662_s15 + $0xf0] sm:$0xff]  ;;  %2346 = vmatprep.subr.bf16.mxu0 %v2502_v31  ;;  %v373_v44 = vld [vmem:[%s2662_s15 + $0x78] sm:$0xff] }
  0x1b   : > { %4019 = vst [vmem:[#allocation2_spill] sm:$0xff] %v2746_v22  ;;  %4020 = vst [vmem:[#allocation3_spill] sm:$0xff] %v2752_v23  ;;  %v374_v55 = vld [vmem:[%s2662_s15 + $0x80] sm:$0xff]  ;;  %v2884_v58 = vld [vmem:[%s2662_s15 + $0x98] sm:$0xff] }
  0x1c   : > { %2450 = vset.pattern.permute.xlu1 %v3968_v1  ;;  %403 = vperm.xlu0 %2448, %v360_v4   ;;  %v2893_v61 = vld [vmem:[%s2662_s15 + $0xa0] sm:$0xff]  ;;  %v2940_v28 = vld [vmem:[%s2662_s15 + $0xf8] sm:$0xff] }
  0x1d   : > { %408 = vperm.xlu1 %2450, %v2676_v5   ;;  %2347 = vmatpush3.bf16.msra.mxu0 %v2502_v31  ;;  %4027 = vst [vmem:[#allocation10_spill] sm:$0xff] %v2940_v28 }
  0x1e   : > { %2348 = vmatprep.subr.bf16.mxu0 %v2503_v35 }
  0x20   : > { %418 = vperm.xlu0 %2448, %v2679_v6  }
  0x21   : > { %2451 = vset.pattern.permute.xlu1 %v3970_v0  ;;  %2349 = vmatpush3.bf16.msra.mxu0 %v2503_v35 }
  0x22   : > { %600 = vperm.xlu1 %2451, %v2676_v5   ;;  %2350 = vmatprep.subr.bf16.mxu0 %v2504_v37 }
  0x24   : > { %423 = vperm.xlu0 %2448, %v364_v7  }
  0x25   : > { %2351 = vmatpush3.bf16.msra.mxu0 %v2504_v37 }
  0x26   : > { %2452 = vset.pattern.permute.xlu1 %v3974_v9  ;;  %2352 = vmatprep.subr.bf16.mxu0 %v2505_v40 }
  0x27   : > { %784 = vperm.xlu1 %2452, %v2665_v2  }
  0x28   : > { %438 = vperm.xlu0 %2448, %v2688_v8  }
  0x29   : > { %2353 = vmatpush3.bf16.msra.mxu0 %v2505_v40 }
  0x2a   : > { %2354 = vmatprep.subr.bf16.mxu0 %v2506_v43 }
  0x2b   : > { %792 = vperm.xlu1 %2452, %v360_v4  }
  0x2c   : > { %443 = vperm.xlu0 %2448, %v2694_v10  }
  0x2d   : > { %2355 = vmatpush3.bf16.msra.mxu0 %v2506_v43 }
  0x2f   : > { %796 = vperm.xlu1 %2452, %v2676_v5  }
  0x30   : > { %458 = vperm.xlu0 %2448, %v2698_v11  }
  0x33   : > { %2453 = vset.pattern.permute.xlu1 %v3972_v13 }
  0x34   : > { %984 = vperm.xlu1 %2453, %v2670_v3   ;;  %463 = vperm.xlu0 %2448, %v2703_v12  }
  0x38   : > { %988 = vperm.xlu1 %2453, %v360_v4   ;;  %478 = vperm.xlu0 %2448, %v2709_v14  }
  0x3c   : > { %2454 = vset.pattern.permute.xlu1 %v3968_v1  ;;  %483 = vperm.xlu0 %2448, %v2713_v15  }
  0x3d   : > { %413 = vperm.xlu1 %2454, %v2716_v16  }
  0x40   : > { %498 = vperm.xlu0 %2448, %v2722_v17  }
  0x41   : > { %2455 = vset.pattern.permute.xlu1 %v3970_v0 }
  0x42   : > { %604 = vperm.xlu1 %2455, %v2716_v16  }
  0x44   : > { %503 = vperm.xlu0 %2448, %v2727_v18  }
  0x46   : > { %608 = vperm.xlu1 %2455, %v2679_v6  }
  0x48   : > { %518 = vperm.xlu0 %2448, %v2732_v19  }
  0x4a   : > { %2456 = vset.pattern.permute.xlu1 %v3968_v1 }
  0x4b   : > { %428 = vperm.xlu1 %2456, %v2737_v20  }
  0x4c   : > { %523 = vperm.xlu0 %2448, %v2740_v21  }
  0x4f   : > { %2457 = vset.pattern.permute.xlu1 %v3970_v0 }
  0x50   : > { %616 = vperm.xlu1 %2457, %v2737_v20   ;;  %538 = vperm.xlu0 %2448, %v2746_v22  }
  0x54   : > { %2458 = vset.pattern.permute.xlu1 %v3974_v9  ;;  %543 = vperm.xlu0 %2448, %v2752_v23  }
  0x55   : > { %800 = vperm.xlu1 %2458, %v2716_v16  }
  0x58   : > { %2492 = vset.pattern.permute.xlu0 %v3970_v0 }
  0x59   : > { %808 = vperm.xlu1 %2458, %v364_v7   ;;  %596 = vperm.xlu0 %2492, %v360_v4   ;;  %v551_v4 = vlaneseq }
  0x5d   : > { %812 = vperm.xlu1 %2458, %v2737_v20   ;;  %612 = vperm.xlu0 %2492, %v364_v7  }
  0x61   : > { %2459 = vset.pattern.permute.xlu1 %v3972_v13  ;;  %628 = vperm.xlu0 %2492, %v2694_v10  }
  0x62   : > { %1000 = vperm.xlu1 %2459, %v2679_v6  }
  0x65   : > { %644 = vperm.xlu0 %2492, %v2703_v12  }
  0x66   : > { %1004 = vperm.xlu1 %2459, %v364_v7  }
  0x69   : > { %660 = vperm.xlu0 %2492, %v2713_v15  }
  0x6a   : > { %2460 = vset.pattern.permute.xlu1 %v3968_v1 }
  0x6b   : > { %433 = vperm.xlu1 %2460, %v2764_v24  }
  0x6d   : > { %676 = vperm.xlu0 %2492, %v2727_v18  }
  0x6f   : > { %2461 = vset.pattern.permute.xlu1 %v3970_v0 }
  0x70   : > { %620 = vperm.xlu1 %2461, %v2764_v24  }
  0x71   : > { %692 = vperm.xlu0 %2492, %v2740_v21  }
  0x74   : > { %624 = vperm.xlu1 %2461, %v2688_v8  }
  0x75   : > { %708 = vperm.xlu0 %2492, %v2752_v23  }
  0x78   : > { %2462 = vset.pattern.permute.xlu1 %v3968_v1 }
  0x79   : > { %448 = vperm.xlu1 %2462, %v2776_v25   ;;  %2494 = vset.pattern.permute.xlu0 %v3974_v9 }
  0x7a   : > { %788 = vperm.xlu0 %2494, %v2670_v3  }
  0x7d   : > { %2463 = vset.pattern.permute.xlu1 %v3970_v0 }
  0x7e   : > { %632 = vperm.xlu1 %2463, %v2776_v25   ;;  %804 = vperm.xlu0 %2494, %v2679_v6   ;;  %v2910_v6 = vld [vmem:[%s2662_s15 + $0xc0] sm:$0xff] }
  0x82   : > { %2464 = vset.pattern.permute.xlu1 %v3974_v9  ;;  %820 = vperm.xlu0 %2494, %v2688_v8  }
  0x83   : > { %816 = vperm.xlu1 %2464, %v2764_v24  }
  0x86   : > { %836 = vperm.xlu0 %2494, %v2698_v11  }
  0x87   : > { %824 = vperm.xlu1 %2464, %v2694_v10  }
  0x8a   : > { %852 = vperm.xlu0 %2494, %v2709_v14  }
  0x8b   : > { %828 = vperm.xlu1 %2464, %v2776_v25  }
  0x8e   : > { %868 = vperm.xlu0 %2494, %v2722_v17  }
  0x8f   : > { %2465 = vset.pattern.permute.xlu1 %v3972_v13 }
  0x90   : > { %1016 = vperm.xlu1 %2465, %v2688_v8   ;;  %v2914_v8 = vshrl.u32 %v551_v4, 7 }
  0x92   : > { %884 = vperm.xlu0 %2494, %v2732_v19   ;;  %4024 = vst [vmem:[#allocation7_spill] sm:$0xff] %v2914_v8 }
  0x93   : > { %v2805_v29 = vpop.permute.xlu1 %588  ;;  %v2807_v30 = vpop.permute.xlu0 %393 }
  0x94   : > { %1020 = vperm.xlu1 %2465, %v2694_v10   ;;  %v2917_v10 = vld [vmem:[%s2662_s15 + $0xd8] sm:$0xff] }
  0x96   : > { %900 = vperm.xlu0 %2494, %v2746_v22  }
  0x97   : > { %v2815_v33 = vpop.permute.xlu1 %592  ;;  %v2817_v34 = vpop.permute.xlu0 %398 }
  0x98   : > { %2466 = vset.pattern.permute.xlu1 %v3968_v1 }
  0x99   : > { %453 = vperm.xlu1 %2466, %v370_v32  }
  0x9a   : > { %2497 = vset.pattern.permute.xlu0 %v3972_v13 }
  0x9b   : > { %980 = vperm.xlu0 %2497, %v2665_v2   ;;  %v2825_v36 = vpop.permute.xlu0 %403  ;;  %v2902_v2 = vld [vmem:[%s2662_s15 + $0xb8] sm:$0xff] }
  0x9c   : > { %v2830_v38 = vpop.permute.xlu1 %408 }
  0x9d   : > { %2467 = vset.pattern.permute.xlu1 %v3970_v0 }
  0x9e   : > { %636 = vperm.xlu1 %2467, %v370_v32  }
  0x9f   : > { %992 = vperm.xlu0 %2497, %v2676_v5   ;;  %v2834_v39 = vpop.permute.xlu0 %418 }
  0xa1   : > { %v2839_v41 = vpop.permute.xlu1 %600 }
  0xa2   : > { %640 = vperm.xlu1 %2467, %v2698_v11  }
  0xa3   : > { %996 = vperm.xlu0 %2497, %v2716_v16   ;;  %v2843_v42 = vpop.permute.xlu0 %423  ;;  %v2926_v16 = vld [vmem:[%s2662_s15 + $0xe0] sm:$0xff] }
  0xa4   : > { %4026 = vst [vmem:[#allocation9_spill] sm:$0xff] %v2926_v16 }
  0xa6   : > { %2468 = vset.pattern.permute.xlu1 %v3968_v1  ;;  %v2850_v45 = vpop.permute.xlu1 %784 }
  0xa7   : > { %468 = vperm.xlu1 %2468, %v373_v44   ;;  %1008 = vperm.xlu0 %2497, %v2737_v20   ;;  %v2853_v46 = vpop.permute.xlu0 %438  ;;  %v553_v20 = vsub.s32 0, %v2914_v8 }
  0xaa   : > { %v2855_v47 = vpop.permute.xlu1 %792 }
  0xab   : > { %2469 = vset.pattern.permute.xlu1 %v3970_v0  ;;  %1012 = vperm.xlu0 %2497, %v2764_v24   ;;  %v2859_v48 = vpop.permute.xlu0 %443  ;;  %v2932_v24 = vld [vmem:[%s3959_s1] sm:$0xf] }
  0xac   : > { %648 = vperm.xlu1 %2469, %v373_v44   ;;  %v2943_v31 = vrot.slane %v2932_v24, %v553_v20 }
  0xae   : > { %v2861_v49 = vpop.permute.xlu1 %796  ;;  %v557_v35 = vmul.f32 %v2943_v31, %v2825_v36 }
  0xaf   : > { %1024 = vperm.xlu0 %2497, %v2776_v25   ;;  %v2864_v50 = vpop.permute.xlu0 %458  ;;  %v717_v25 = vsub.s32 1, %v2914_v8 }
  0xb0   : > { %2470 = vset.pattern.permute.xlu1 %v3974_v9 }
  0xb1   : > { %832 = vperm.xlu1 %2470, %v370_v32  }
  0xb3   : > { %v2867_v51 = vpop.permute.xlu1 %984  ;;  %1028 = vperm.xlu0 %2497, %v370_v32   ;;  %v2869_v52 = vpop.permute.xlu0 %463  ;;  %v2947_v32 = vrot.slane %v2932_v24, %v717_v25 }
  0xb5   : > { %840 = vperm.xlu1 %2470, %v2703_v12   ;;  %v720_v23 = vmul.f32 %v2947_v32, %v2815_v33 }
  0xb7   : > { %v2872_v53 = vpop.permute.xlu1 %988  ;;  %v2874_v54 = vpop.permute.xlu0 %478  ;;  %1040 = vperm.xlu0 %2497, %v373_v44  }
  0xb8   : > { %4021 = vst [vmem:[#allocation4_spill] sm:$0xff] %v2874_v54 }
  0xb9   : > { %844 = vperm.xlu1 %2470, %v373_v44   ;;  %v561_v44 = vmul.f32 %v2943_v31, %v2843_v42 }
  0xbb   : > { %v2877_v56 = vpop.permute.xlu0 %483  ;;  %1044 = vperm.xlu0 %2497, %v374_v55  }
  0xbc   : > { %v2879_v57 = vpop.permute.xlu1 %413 }
  0xbd   : > { %2471 = vset.pattern.permute.xlu1 %v3972_v13 }
  0xbe   : > { %1032 = vperm.xlu1 %2471, %v2698_v11  }
  0xbf   : > { %v2886_v59 = vpop.permute.xlu0 %498  ;;  %1056 = vperm.xlu0 %2497, %v2884_v58  }
  0xc0   : > { %4022 = vst [vmem:[#allocation5_spill] sm:$0xff] %v2886_v59  ;;  %v4037_v59 = vmov 2  }
  0xc1   : > { %v2889_v60 = vpop.permute.xlu1 %604 }
  0xc2   : > { %1036 = vperm.xlu1 %2471, %v2703_v12  }
  0xc3   : > { %v2895_v62 = vpop.permute.xlu0 %503  ;;  %1060 = vperm.xlu0 %2497, %v2893_v61  }
  0xc5   : > { %v2898_v63 = vpop.permute.xlu1 %608 }
  0xc6   : > { %2472 = vset.pattern.permute.xlu1 %v3968_v1 }
  0xc7   : > { %473 = vperm.xlu1 %2472, %v374_v55   ;;  %v2904_v3 = vpop.permute.xlu0 %518  ;;  %1072 = vperm.xlu0 %2497, %v2902_v2  }
  0xc8   : > { %4023 = vst [vmem:[#allocation6_spill] sm:$0xff] %v2904_v3 }
  0xca   : > { %v2907_v5 = vpop.permute.xlu1 %428 }
  0xcb   : > { %2473 = vset.pattern.permute.xlu1 %v3970_v0  ;;  %v524_v7 = vpop.permute.xlu0 %523  ;;  %1076 = vperm.xlu0 %2497, %v2910_v6  }
  0xcc   : > { %652 = vperm.xlu1 %2473, %v374_v55  }
  0xcf   : > { %v2919_v11 = vpop.permute.xlu1 %616  ;;  %v2921_v12 = vpop.permute.xlu0 %538  ;;  %1088 = vperm.xlu0 %2497, %v2917_v10  }
  0xd0   : > { %4025 = vst [vmem:[#allocation8_spill] sm:$0xff] %v2921_v12  ;;  %656 = vperm.xlu1 %2473, %v2709_v14   ;;  %v4030_v12 = vmov 3  }
  0xd3   : > { %v544_v26 = vpop.permute.xlu0 %543  ;;  %1092 = vperm.xlu0 %2497, %v2926_v16   ;;  %v1109_v16 = vsub.s32 3, %v2914_v8 }
  0xd4   : > { %2474 = vset.pattern.permute.xlu1 %v3968_v1  ;;  %v2937_v27 = vpop.permute.xlu1 %800  ;;  %v565_v1 = vmul.f32 %v2943_v31, %v2859_v48 }
  0xd5   : > { %488 = vperm.xlu1 %2474, %v2884_v58  }
  0xd7   : > { %1104 = vperm.xlu0 %2497, %v2940_v28   ;;  %v556_v28 = vmul.f32 %v2943_v31, %v2817_v34  ;;  %v719_v34 = vmul.f32 %v2947_v32, %v2805_v29 }
  0xd8   : > { %v2952_v37 = vpop.permute.xlu1 %808  ;;  %v597_v40 = vpop.permute.xlu0 %596 }
  0xd9   : > { %v721_v43 = vmul.f32 %v2947_v32, %v597_v40  ;;  %2475 = vset.pattern.permute.xlu1 %v3970_v0 }
  0xda   : > { %664 = vperm.xlu1 %2475, %v2884_v58  }
  0xdb   : > { %v2959_v4 = vadd.f32 %v721_v43, %v557_v35  ;;  %v569_v35 = vmul.f32 %v2943_v31, %v2869_v52 }
  0xdc   : > { %v2961_v20 = vpop.permute.xlu1 %812  ;;  %v613_v25 = vpop.permute.xlu0 %612 }
  0xdd   : > { %v725_v36 = vmul.f32 %v2947_v32, %v613_v25 }
  0xde   : > { %2476 = vset.pattern.permute.xlu1 %v3974_v9 }
  0xdf   : > { %v2967_v40 = vadd.f32 %v725_v36, %v561_v44  ;;  %848 = vperm.xlu1 %2476, %v374_v55   ;;  %v573_v55 = vmul.f32 %v2943_v31, %v2877_v56 }
  0xe0   : > { %v629_v0 = vpop.permute.xlu0 %628 }
  0xe1   : > { %v2969_v13 = vpop.permute.xlu1 %1000  ;;  %v729_v42 = vmul.f32 %v2947_v32, %v629_v0 }
  0xe3   : > { %v2974_v43 = vadd.f32 %v729_v42, %v565_v1  ;;  %856 = vperm.xlu1 %2476, %v2713_v15   ;;  %v577_v1 = vmul.f32 %v2943_v31, %v2895_v62 }
  0xe4   : > { %v645_v25 = vpop.permute.xlu0 %644 }
  0xe5   : > { %v2977_v9 = vpop.permute.xlu1 %1004  ;;  %v733_v48 = vmul.f32 %v2947_v32, %v645_v25 }
  0xe7   : > { %v2982_v44 = vadd.f32 %v733_v48, %v569_v35  ;;  %860 = vperm.xlu1 %2476, %v2884_v58   ;;  %v581_v35 = vmul.f32 %v2943_v31, %v524_v7 }
  0xe8   : > { %v661_v0 = vpop.permute.xlu0 %660 }
  0xe9   : > { %4028 = vst [vmem:[#allocation11_spill] sm:$0xff] %v2982_v44  ;;  %v737_v36 = vmul.f32 %v2947_v32, %v661_v0  ;;  %v3055_v44 = vrot.slane %v2932_v24, %v1109_v16  ;;  %v724_v16 = vmul.f32 %v2947_v32, %v2898_v63  ;;  %v558_v63 = vmul.f32 %v2943_v31, %v2830_v38  ;;  %v3096_v38 = vld [vmem:[%s3960_s2] ss:$0 sm:$0xff] }
  0xea   : > { %v2986_v52 = vpop.permute.xlu1 %433 }
  0xeb   : > { %v2990_v42 = vadd.f32 %v737_v36, %v573_v55  ;;  %2477 = vset.pattern.permute.xlu1 %v4030_v12  ;;  %v585_v55 = vmul.f32 %v2943_v31, %v544_v26 }
  0xec   : > { %1048 = vperm.xlu1 %2477, %v2709_v14   ;;  %v677_v25 = vpop.permute.xlu0 %676  ;;  %v4033_v14 = vmov 0  }
  0xed   : > { %4029 = vst [vmem:[#allocation12_spill] sm:$0xff] %v2990_v42  ;;  %v741_v56 = vmul.f32 %v2947_v32, %v677_v25 }
  0xef   : > { %v2996_v58 = vadd.f32 %v741_v56, %v577_v1  ;;  %v2998_v48 = vpop.permute.xlu1 %620 }
  0xf0   : > { %1052 = vperm.xlu1 %2477, %v2713_v15   ;;  %v693_v0 = vpop.permute.xlu0 %692  ;;  %v4035_v15 = vmov 1  }
  0xf1   : > { %4031 = vst [vmem:[#allocation13_spill] sm:$0xff] %v2996_v58  ;;  %v745_v62 = vmul.f32 %v2947_v32, %v693_v0  ;;  %v913_v58 = vsub.s32 2, %v2914_v8 }
  0xf3   : > { %v3003_v36 = vadd.f32 %v745_v62, %v581_v35  ;;  %v3005_v3 = vpop.permute.xlu1 %624  ;;  %v3045_v22 = vrot.slane %v2932_v24, %v913_v58  ;;  %v555_v58 = vmul.f32 %v2943_v31, %v2807_v30  ;;  %v1112_v30 = vmul.f32 %v3055_v44, %v2867_v51 }
  0xf4   : > { %2478 = vset.pattern.permute.xlu1 %v4033_v14  ;;  %v709_v25 = vpop.permute.xlu0 %708  ;;  %v1113_v51 = vmul.f32 %v3055_v44, %v2872_v53  ;;  %v564_v53 = vmul.f32 %v2943_v31, %v2853_v46 }
  0xf5   : > { %4032 = vst [vmem:[#allocation14_spill] sm:$0xff] %v3003_v36  ;;  %493 = vperm.xlu1 %2478, %v2893_v61   ;;  %v749_v7 = vmul.f32 %v2947_v32, %v709_v25  ;;  %v915_v29 = vmul.f32 %v3045_v22, %v2850_v45  ;;  %v918_v45 = vmul.f32 %v3045_v22, %v2861_v49 }
  0xf7   : > { %v3010_v1 = vadd.f32 %v749_v7, %v585_v55 }
  0xf8   : > { %v3012_v56 = vpop.permute.xlu1 %448 }
  0xf9   : > { %4034 = vst [vmem:[#allocation15_spill] sm:$0xff] %v3010_v1  ;;  %2479 = vset.pattern.permute.xlu1 %v4035_v15  ;;  %v789_v0 = vpop.permute.xlu0 %788 }
  0xfa   : > { %668 = vperm.xlu1 %2479, %v2893_v61   ;;  %v916_v54 = vmul.f32 %v3045_v22, %v789_v0 }
  0xfd   : > { %v3016_v26 = vpop.permute.xlu1 %632  ;;  %v805_v35 = vpop.permute.xlu0 %804 }
  0xfe   : > { %672 = vperm.xlu1 %2479, %v2722_v17   ;;  %v920_v24 = vmul.f32 %v3045_v22, %v805_v35  ;;  %v723_v35 = vmul.f32 %v2947_v32, %v2889_v60 }
 0x101   : > { %v3019_v62 = vpop.permute.xlu0 %820 }
 0x102   : > { %2480 = vset.pattern.permute.xlu1 %v4033_v14  ;;  %v3022_v36 = vpop.permute.xlu1 %816 }
 0x103   : > { %508 = vperm.xlu1 %2480, %v2902_v2  }
 0x105   : > { %v3025_v55 = vpop.permute.xlu0 %836 }
 0x106   : > { %v3027_v25 = vpop.permute.xlu1 %824 }
 0x107   : > { %2481 = vset.pattern.permute.xlu1 %v4035_v15 }
 0x108   : > { %680 = vperm.xlu1 %2481, %v2902_v2  }
 0x109   : > { %v3031_v7 = vpop.permute.xlu0 %852 }
 0x10a   : > { %4036 = vst [vmem:[#allocation16_spill] sm:$0xff] %v3031_v7  ;;  %v3033_v1 = vpop.permute.xlu1 %828 }
 0x10c   : > { %2482 = vset.pattern.permute.xlu1 %v4037_v59 }
 0x10d   : > { %864 = vperm.xlu1 %2482, %v2893_v61   ;;  %v3038_v42 = vpop.permute.xlu0 %868 }
 0x10e   : > { %4038 = vst [vmem:[#allocation17_spill] sm:$0xff] %v3038_v42  ;;  %v752_v42 = vadd.f32 %v720_v23, %v556_v28  ;;  %v917_v23 = vmul.f32 %v3045_v22, %v2855_v47  ;;  %v751_v28 = vadd.f32 %v719_v34, %v555_v58 }
 0x10f   : > { %v3048_v7 = vpop.permute.xlu1 %1016 }
 0x110   : > { %v948_v8 = vadd.f32 %v916_v54, %v752_v42  ;;  %v722_v54 = vmul.f32 %v2947_v32, %v2839_v41  ;;  %v947_v42 = vadd.f32 %v915_v29, %v751_v28  ;;  %v726_v29 = vmul.f32 %v2947_v32, %v2919_v11 }
 0x111   : > { %872 = vperm.xlu1 %2482, %v2727_v18   ;;  %v3052_v61 = vpop.permute.xlu0 %884  ;;  %v921_v11 = vmul.f32 %v3045_v22, %v2952_v37 }
 0x112   : > { %4039 = vst [vmem:[#allocation18_spill] sm:$0xff] %v3052_v61  ;;  %v560_v61 = vmul.f32 %v2943_v31, %v2834_v39  ;;  %v1144_v47 = vadd.f32 %v1112_v30, %v948_v8  ;;  %v754_v8 = vadd.f32 %v722_v54, %v558_v63  ;;  %v919_v30 = vmul.f32 %v3045_v22, %v2937_v27 }
 0x113   : > { %v3057_v33 = vpop.permute.xlu1 %1020  ;;  %v1116_v54 = vmul.f32 %v3055_v44, %v2969_v13  ;;  %v1117_v27 = vmul.f32 %v3055_v44, %v2977_v9  ;;  %v953_v37 = vadd.f32 %v921_v11, %v2967_v40 }
 0x114   : > { %v756_v41 = vadd.f32 %v724_v16, %v560_v61  ;;  %v1183_v60 = vadd.f32 %v3096_v38, %v1144_v47  ;;  %v950_v16 = vadd.f32 %v918_v45, %v754_v8  ;;  %v1121_v11 = vmul.f32 %v3055_v44, %v3057_v33 }
 0x115   : > { %876 = vperm.xlu1 %2482, %v2902_v2   ;;  %v3064_v0 = vpop.permute.xlu0 %900  ;;  %v949_v2 = vadd.f32 %v917_v23, %v2959_v4 }
 0x116   : > { %v952_v49 = vadd.f32 %v920_v24, %v756_v41 }
 0x117   : > { %v1145_v58 = vadd.f32 %v1113_v51, %v949_v2  ;;  %v1215_v51 = vmax.f32 %v1183_v60, 0.0 }
 0x118   : > { %v3080_v39 = vpop.permute.xlu1 %453  ;;  %v1148_v47 = vadd.f32 %v1116_v54, %v952_v49  ;;  %v727_v49 = vmul.f32 %v2947_v32, %v2998_v48  ;;  %v925_v48 = vmul.f32 %v3045_v22, %v3027_v25 }
 0x119   : > { %2483 = vset.pattern.permute.xlu1 %v4030_v12  ;;  %v1184_v13 = vadd.f32 %v3096_v38, %v1145_v58  ;;  %v1149_v58 = vadd.f32 %v1117_v27, %v953_v37 }
 0x11a   : > { %1064 = vperm.xlu1 %2483, %v2722_v17   ;;  %v981_v4 = vpop.permute.xlu0 %980  ;;  %v559_v17 = vmul.f32 %v2943_v31, %v2879_v57  ;;  %v562_v57 = vmul.f32 %v2943_v31, %v2907_v5  ;;  %v1187_v40 = vadd.f32 %v3096_v38, %v1148_v47 }
 0x11b   : > { %v1111_v34 = vmul.f32 %v3055_v44, %v981_v4 }
 0x11c   : > { %v755_v2 = vadd.f32 %v723_v35, %v559_v17  ;;  %v758_v41 = vadd.f32 %v726_v29, %v562_v57  ;;  %v924_v35 = vmul.f32 %v3045_v22, %v3019_v62  ;;  %v563_v29 = vmul.f32 %v2943_v31, %v2986_v52 }
 0x11d   : > { %v1143_v61 = vadd.f32 %v1111_v34, %v947_v42  ;;  %v3102_v23 = vpop.permute.xlu1 %636  ;;  %v922_v42 = vmul.f32 %v3045_v22, %v2961_v20  ;;  %v1216_v20 = vmax.f32 %v1184_v13, 0.0  ;;  %v1219_v25 = vmax.f32 %v1187_v40, 0.0 }
 0x11e   : > { %1068 = vperm.xlu1 %2483, %v2727_v18   ;;  %v993_v46 = vpop.permute.xlu0 %992  ;;  %v728_v18 = vmul.f32 %v2947_v32, %v3005_v3  ;;  %v951_v4 = vadd.f32 %v919_v30, %v755_v2  ;;  %v923_v30 = vmul.f32 %v3045_v22, %v3022_v36  ;;  %v759_v52 = vadd.f32 %v727_v49, %v563_v29 }
 0x11f   : > { %v1114_v24 = vmul.f32 %v3055_v44, %v993_v46  ;;  %v1182_v28 = vadd.f32 %v3096_v38, %v1143_v61  ;;  %v1120_v61 = vmul.f32 %v3055_v44, %v3048_v7  ;;  %v730_v36 = vmul.f32 %v2947_v32, %v3016_v26 }
 0x120   : > { %v760_v17 = vadd.f32 %v728_v18, %v564_v53  ;;  %v566_v13 = vmul.f32 %v2943_v31, %v3012_v56  ;;  %v955_v18 = vadd.f32 %v923_v30, %v759_v52  ;;  %v926_v26 = vmul.f32 %v3045_v22, %v3033_v1 }
 0x121   : > { %v1146_v63 = vadd.f32 %v1114_v24, %v950_v16  ;;  %v3123_v45 = vpop.permute.xlu1 %640  ;;  %v1214_v5 = vmax.f32 %v1182_v28, 0.0  ;;  %v954_v16 = vadd.f32 %v922_v42, %v758_v41  ;;  %v1188_v24 = vadd.f32 %v3096_v38, %v1149_v58 }
 0x122   : > { %2484 = vset.pattern.permute.xlu1 %v4033_v14  ;;  %v997_v9 = vpop.permute.xlu0 %996  ;;  %v956_v53 = vadd.f32 %v924_v35, %v760_v17  ;;  %v762_v33 = vadd.f32 %v730_v36, %v566_v13  ;;  %v567_v29 = vmul.f32 %v2943_v31, %v3080_v39 }
 0x123   : > { %v1185_v3 = vadd.f32 %v3096_v38, %v1146_v63  ;;  %v1115_v34 = vmul.f32 %v3055_v44, %v997_v9  ;;  %513 = vperm.xlu1 %2484, %v2910_v6   ;;  %v1246_v8 = vpack.c.bf16 %v1215_v51, %v1214_v5  ;;  %v957_v63 = vadd.f32 %v925_v48, %v2974_v43 }
 0x124   : > { %v1152_v28 = vadd.f32 %v1120_v61, %v956_v53  ;;  %v1220_v37 = vmax.f32 %v1188_v24, 0.0 }
 0x125   : > { %v1217_v60 = vmax.f32 %v1185_v3, 0.0  ;;  %v1147_v62 = vadd.f32 %v1115_v34, %v951_v4  ;;  %2356 = vmatprep.mubr.bf16.mxu0 %v1246_v8  ;;  %v1153_v56 = vadd.f32 %v1121_v11, %v957_v63  ;;  %v958_v34 = vadd.f32 %v926_v26, %v762_v33  ;;  %v4040_v33 = vld [vmem:[#allocation11_spill] sm:$0xff] }
 0x126   : > { %v3145_v54 = vpop.permute.xlu1 %468  ;;  %v1009_v46 = vpop.permute.xlu0 %1008  ;;  %v1191_v9 = vadd.f32 %v3096_v38, %v1152_v28 }
 0x127   : > { %v1186_v2 = vadd.f32 %v3096_v38, %v1147_v62  ;;  %v1118_v7 = vmul.f32 %v3055_v44, %v1009_v46  ;;  %2485 = vset.pattern.permute.xlu1 %v4035_v15  ;;  %v1247_v57 = vpack.c.bf16 %v1217_v60, %v1216_v20  ;;  %v1192_v20 = vadd.f32 %v3096_v38, %v1153_v56 }
 0x128   : > { %684 = vperm.xlu1 %2485, %v2910_v6   ;;  %v1223_v61 = vmax.f32 %v1191_v9, 0.0  ;;  %v731_v60 = vmul.f32 %v2947_v32, %v3102_v23  ;;  %v732_v23 = vmul.f32 %v2947_v32, %v3123_v45  ;;  %v570_v52 = vmul.f32 %v2943_v31, %v3145_v54 }
 0x129   : > { %v1218_v27 = vmax.f32 %v1186_v2, 0.0  ;;  %v1150_v47 = vadd.f32 %v1118_v7, %v954_v16  ;;  %2357 = vmatmul.mubr.bf16.vlgmr.msra.gmra.mrb[0].mxu0 %v1247_v57  ;;  %v1224_v2 = vmax.f32 %v1192_v20, 0.0  ;;  %v568_v7 = vmul.f32 %v2943_v31, %v2864_v50 }
 0x12a   : > { %v1013_v5 = vpop.permute.xlu0 %1012  ;;  %v763_v57 = vadd.f32 %v731_v60, %v567_v29  ;;  %v4042_v60 = vld [vmem:[#allocation16_spill] sm:$0xff]  ;;  %v4043_v29 = vld [vmem:[#allocation9_spill] sm:$0xff] }
 0x12b   : > { %v1189_v51 = vadd.f32 %v3096_v38, %v1150_v47  ;;  %v1119_v41 = vmul.f32 %v3055_v44, %v1013_v5  ;;  %v649_v4 = vpop.permute.xlu1 %648  ;;  %v1248_v42 = vpack.c.bf16 %v1219_v25, %v1218_v27  ;;  %v928_v27 = vmul.f32 %v3045_v22, %v3025_v55 }
 0x12c   : > { %688 = vperm.xlu1 %2485, %v2732_v19   ;;  %v734_v24 = vmul.f32 %v2947_v32, %v649_v4  ;;  %v764_v45 = vadd.f32 %v732_v23, %v568_v7 }
 0x12d   : > { %v1221_v35 = vmax.f32 %v1189_v51, 0.0  ;;  %v1151_v3 = vadd.f32 %v1119_v41, %v955_v18  ;;  %2360 = vmatprep.mubr.bf16.mxu0 %v1248_v42 }
 0x12e   : > { %v1025_v43 = vpop.permute.xlu0 %1024  ;;  %v766_v47 = vadd.f32 %v734_v24, %v570_v52  ;;  %v960_v26 = vadd.f32 %v928_v27, %v764_v45 }
 0x12f   : > { %v1190_v1 = vadd.f32 %v3096_v38, %v1151_v3  ;;  %v1122_v8 = vmul.f32 %v3055_v44, %v1025_v43  ;;  %v1249_v58 = vpack.c.bf16 %v1221_v35, %v1220_v37 }
 0x130   : > { %2486 = vset.pattern.permute.xlu1 %v4033_v14  ;;  %v833_v49 = vpop.permute.xlu1 %832 }
 0x131   : > { %v1222_v40 = vmax.f32 %v1190_v1, 0.0  ;;  %v1154_v17 = vadd.f32 %v1122_v8, %v958_v34  ;;  %528 = vperm.xlu1 %2486, %v2917_v10   ;;  %2361 = vmatmul.mubr.bf16.gmra.mrb[4].mxu0 %v1249_v58  ;;  %v927_v30 = vmul.f32 %v3045_v22, %v833_v49 }
 0x132   : > { %v1029_v53 = vpop.permute.xlu0 %1028 }
 0x133   : > { %v1193_v62 = vadd.f32 %v3096_v38, %v1154_v17  ;;  %v1250_v16 = vpack.c.bf16 %v1223_v61, %v1222_v40  ;;  %v959_v36 = vadd.f32 %v927_v30, %v763_v57  ;;  %v1123_v25 = vmul.f32 %v3055_v44, %v1029_v53  ;;  %v4041_v17 = vld [vmem:[#allocation4_spill] sm:$0xff] }
 0x134   : > { %v841_v48 = vpop.permute.xlu1 %840  ;;  %v572_v61 = vmul.f32 %v2943_v31, %v4041_v17 }
 0x135   : > { %v1225_v46 = vmax.f32 %v1193_v62, 0.0  ;;  %2487 = vset.pattern.permute.xlu1 %v4035_v15  ;;  %2364 = vmatprep.mubr.bf16.mxu0 %v1250_v16  ;;  %v1155_v13 = vadd.f32 %v1123_v25, %v959_v36  ;;  %v929_v5 = vmul.f32 %v3045_v22, %v841_v48  ;;  %v932_v62 = vmul.f32 %v3045_v22, %v4042_v60  ;;  %v2513_v60 = vld [vmem:[%s3963_s5 + $0x30] sm:$0xff]  }
 0x136   : > { %696 = vperm.xlu1 %2487, %v2917_v10   ;;  %v1041_v50 = vpop.permute.xlu0 %1040 }
 0x137   : > { %v1251_v39 = vpack.c.bf16 %v1225_v46, %v1224_v2  ;;  %v1126_v54 = vmul.f32 %v3055_v44, %v1041_v50  ;;  %v1194_v55 = vadd.f32 %v3096_v38, %v1155_v13  ;;  %v961_v37 = vadd.f32 %v929_v5, %v4040_v33  ;;  %v4044_v46 = vld [vmem:[#allocation2_spill] sm:$0xff]  ;;  %v4047_v33 = vld [vmem:[#allocation12_spill] sm:$0xff] }
 0x138   : > { %v845_v28 = vpop.permute.xlu1 %844  ;;  %v4045_v2 = vld [vmem:[#allocation10_spill] sm:$0xff] }
 0x139   : > { %v930_v11 = vmul.f32 %v3045_v22, %v845_v28  ;;  %2365 = vmatmul.mubr.bf16.gmra.mrb[8].mxu0 %v1251_v39  ;;  %v1226_v56 = vmax.f32 %v1194_v55, 0.0 }
 0x13a   : > { %2488 = vset.pattern.permute.xlu1 %v4037_v59  ;;  %v1045_v39 = vpop.permute.xlu0 %1044 }
 0x13b   : > { %880 = vperm.xlu1 %2488, %v2910_v6   ;;  %v962_v18 = vadd.f32 %v930_v11, %v766_v47  ;;  %v1127_v11 = vmul.f32 %v3055_v44, %v1045_v39  ;;  %v2508_v47 = vld [vmem:[%s3963_s5 + $0x8] sm:$0xff]  }
 0x13d   : > { %v1033_v63 = vpop.permute.xlu1 %1032  ;;  %v1158_v41 = vadd.f32 %v1126_v54, %v962_v18 }
 0x13e   : > { %v1124_v51 = vmul.f32 %v3055_v44, %v1033_v63  ;;  %v1057_v45 = vpop.permute.xlu0 %1056 }
 0x13f   : > { %888 = vperm.xlu1 %2488, %v2740_v21   ;;  %v1197_v35 = vadd.f32 %v3096_v38, %v1158_v41  ;;  %v1130_v54 = vmul.f32 %v3055_v44, %v1057_v45 }
 0x140   : > { %v1156_v4 = vadd.f32 %v1124_v51, %v960_v26  ;;  %v4046_v51 = vld [vmem:[#allocation3_spill] sm:$0xff] }
 0x141   : > { %v1037_v42 = vpop.permute.xlu1 %1036  ;;  %v1229_v58 = vmax.f32 %v1197_v35, 0.0 }
 0x142   : > { %v1195_v6 = vadd.f32 %v3096_v38, %v1156_v4  ;;  %v1125_v9 = vmul.f32 %v3055_v44, %v1037_v42 }
 0x143   : > { %892 = vperm.xlu1 %2488, %v2917_v10  }
 0x144   : > { %v1227_v3 = vmax.f32 %v1195_v6, 0.0  ;;  %v1157_v43 = vadd.f32 %v1125_v9, %v961_v37 }
 0x146   : > { %v1196_v34 = vadd.f32 %v3096_v38, %v1157_v43  ;;  %v474_v1 = vpop.permute.xlu1 %473  ;;  %v1252_v8 = vpack.c.bf16 %v1227_v3, %v1226_v56  ;;  %v2510_v56 = vld [vmem:[%s3963_s5 + $0x18] sm:$0xff]  }
 0x147   : > { %2489 = vset.pattern.permute.xlu1 %v4030_v12  ;;  %v571_v57 = vmul.f32 %v2943_v31, %v474_v1 }
 0x148   : > { %v1228_v49 = vmax.f32 %v1196_v34, 0.0  ;;  %1080 = vperm.xlu1 %2489, %v2732_v19   ;;  %2368 = vmatprep.mubr.bf16.mxu0 %v1252_v8 }
 0x14a   : > { %v1253_v20 = vpack.c.bf16 %v1229_v58, %v1228_v49  ;;  %v2511_v49 = vld [vmem:[%s3963_s5 + $0x20] sm:$0xff]  }
 0x14b   : > { %v653_v40 = vpop.permute.xlu1 %652 }
 0x14c   : > { %1084 = vperm.xlu1 %2489, %v2740_v21   ;;  %2369 = vmatmul.mubr.bf16.gmra.mrb[12].mxu0 %v1253_v20  ;;  %v735_v7 = vmul.f32 %v2947_v32, %v653_v40 }
 0x14e   : > { %v767_v52 = vadd.f32 %v735_v7, %v571_v57 }
 0x14f   : > { %v657_v10 = vpop.permute.xlu1 %656 }
 0x150   : > { %v736_v16 = vmul.f32 %v2947_v32, %v657_v10  ;;  %2490 = vset.pattern.permute.xlu1 %v4033_v14 }
 0x151   : > { %533 = vperm.xlu1 %2490, %v4043_v29  }
 0x152   : > { %v768_v19 = vadd.f32 %v736_v16, %v572_v61  ;;  %v2512_v61 = vld [vmem:[%s3963_s5 + $0x28] sm:$0xff]  }
 0x154   : > { %v489_v30 = vpop.permute.xlu1 %488  ;;  %v964_v48 = vadd.f32 %v932_v62, %v768_v19  ;;  %v4048_v62 = vld [vmem:[#allocation5_spill] sm:$0xff] }
 0x155   : > { %2491 = vset.pattern.permute.xlu1 %v4035_v15  ;;  %v574_v25 = vmul.f32 %v2943_v31, %v489_v30  ;;  %v576_v16 = vmul.f32 %v2943_v31, %v4048_v62 }
 0x156   : > { %700 = vperm.xlu1 %2491, %v4043_v29  }
 0x159   : > { %v665_v21 = vpop.permute.xlu1 %664 }
 0x15a   : > { %704 = vperm.xlu1 %2491, %v4044_v46   ;;  %v738_v36 = vmul.f32 %v2947_v32, %v665_v21  ;;  %v2514_v21 = vld [vmem:[%s3963_s5 + $0x38] sm:$0xff]  }
 0x15e   : > { %2493 = vset.pattern.permute.xlu1 %v4033_v14  ;;  %v849_v53 = vpop.permute.xlu1 %848  ;;  %v2507_v14 = vld [vmem:[%s3963_s5] sm:$0xff]  }
 0x15f   : > { %548 = vperm.xlu1 %2493, %v4045_v2   ;;  %v931_v23 = vmul.f32 %v3045_v22, %v849_v53  ;;  %2388 = vmatprep.subr.bf16.mxu1 %v2507_v14 }
 0x160   : > { %2389 = vmatpush3.bf16.msra.mxu1 %v2507_v14 }
 0x161   : > { %v963_v28 = vadd.f32 %v931_v23, %v767_v52  ;;  %2390 = vmatprep.subr.bf16.mxu1 %v2508_v47  ;;  %v1061_v52 = vpop.permute.xlu0 %1060 }
 0x162   : > { %v857_v24 = vpop.permute.xlu1 %856 }
 0x163   : > { %2495 = vset.pattern.permute.xlu1 %v4035_v15  ;;  %v770_v15 = vadd.f32 %v738_v36, %v574_v25  ;;  %v1159_v13 = vadd.f32 %v1127_v11, %v963_v28  ;;  %v933_v5 = vmul.f32 %v3045_v22, %v857_v24  ;;  %v1131_v11 = vmul.f32 %v3055_v44, %v1061_v52 }
 0x164   : > { %712 = vperm.xlu1 %2495, %v4045_v2   ;;  %2391 = vmatpush3.bf16.msra.mxu1 %v2508_v47 }
 0x165   : > { %v1198_v55 = vadd.f32 %v3096_v38, %v1159_v13  ;;  %v965_v37 = vadd.f32 %v933_v5, %v4047_v33  ;;  %v1073_v45 = vpop.permute.xlu0 %1072 }
 0x166   : > { %v861_v50 = vpop.permute.xlu1 %860 }
 0x167   : > { %v934_v27 = vmul.f32 %v3045_v22, %v861_v50  ;;  %v1230_v35 = vmax.f32 %v1198_v55, 0.0 }
 0x168   : > { %2496 = vset.pattern.permute.xlu1 %v4037_v59  ;;  %v2509_v59 = vld [vmem:[%s3963_s5 + $0x10] sm:$0xff]  }
 0x169   : > { %896 = vperm.xlu1 %2496, %v4043_v29   ;;  %v966_v18 = vadd.f32 %v934_v27, %v770_v15  ;;  %2392 = vmatprep.subr.bf16.mxu1 %v2509_v59  ;;  %v4049_v29 = vld [vmem:[#allocation17_spill] sm:$0xff] }
 0x16a   : > { %2393 = vmatpush3.bf16.msra.mxu1 %v2509_v59  ;;  %v936_v19 = vmul.f32 %v3045_v22, %v4049_v29 }
 0x16b   : > { %v1049_v63 = vpop.permute.xlu1 %1048  ;;  %v1162_v41 = vadd.f32 %v1130_v54, %v966_v18  ;;  %2394 = vmatprep.subr.bf16.mxu1 %v2510_v56  ;;  %v1134_v18 = vmul.f32 %v3055_v44, %v1073_v45 }
 0x16c   : > { %v1128_v26 = vmul.f32 %v3055_v44, %v1049_v63 }
 0x16d   : > { %904 = vperm.xlu1 %2496, %v4046_v51   ;;  %v1201_v3 = vadd.f32 %v3096_v38, %v1162_v41  ;;  %v4050_v41 = vld [vmem:[#allocation13_spill] sm:$0xff] }
 0x16e   : > { %v1160_v4 = vadd.f32 %v1128_v26, %v964_v48  ;;  %2395 = vmatpush3.bf16.msra.mxu1 %v2510_v56 }
 0x16f   : > { %v1053_v42 = vpop.permute.xlu1 %1052  ;;  %v1233_v20 = vmax.f32 %v1201_v3, 0.0  ;;  %2396 = vmatprep.subr.bf16.mxu1 %v2511_v49 }
 0x170   : > { %v1199_v6 = vadd.f32 %v3096_v38, %v1160_v4  ;;  %v1129_v9 = vmul.f32 %v3055_v44, %v1053_v42 }
 0x171   : > { %908 = vperm.xlu1 %2496, %v4045_v2  }
 0x172   : > { %v1231_v43 = vmax.f32 %v1199_v6, 0.0  ;;  %v1161_v34 = vadd.f32 %v1129_v9, %v965_v37  ;;  %2397 = vmatpush3.bf16.msra.mxu1 %v2511_v49 }
 0x173   : > { %2398 = vmatprep.subr.bf16.mxu1 %v2512_v61 }
 0x174   : > { %v1200_v1 = vadd.f32 %v3096_v38, %v1161_v34  ;;  %v494_v8 = vpop.permute.xlu1 %493  ;;  %v1254_v58 = vpack.c.bf16 %v1231_v43, %v1230_v35 }
 0x175   : > { %2498 = vset.pattern.permute.xlu1 %v4030_v12  ;;  %v575_v23 = vmul.f32 %v2943_v31, %v494_v8 }
 0x176   : > { %v1232_v40 = vmax.f32 %v1200_v1, 0.0  ;;  %1096 = vperm.xlu1 %2498, %v4044_v46   ;;  %2372 = vmatprep.mubr.bf16.mxu0 %v1254_v58 }
 0x177   : > { %2399 = vmatpush3.bf16.msra.mxu1 %v2512_v61 }
 0x178   : > { %v1255_v10 = vpack.c.bf16 %v1233_v20, %v1232_v40  ;;  %2400 = vmatprep.subr.bf16.mxu1 %v2513_v60  ;;  %v4051_v20 = vld [vmem:[#allocation6_spill] sm:$0xff] }
 0x179   : > { %v669_v17 = vpop.permute.xlu1 %668  ;;  %v580_v40 = vmul.f32 %v2943_v31, %v4051_v20 }
 0x17a   : > { %1100 = vperm.xlu1 %2498, %v4046_v51   ;;  %2373 = vmatmul.mubr.bf16.gmra.mrb[16].mxu0 %v1255_v10  ;;  %v739_v57 = vmul.f32 %v2947_v32, %v669_v17  ;;  %v4052_v17 = vld [vmem:[#allocation18_spill] sm:$0xff] }
 0x17b   : > { %2401 = vmatpush3.bf16.msra.mxu1 %v2513_v60  ;;  %v940_v61 = vmul.f32 %v3045_v22, %v4052_v17 }
 0x17c   : > { %2402 = vmatprep.subr.bf16.mxu1 %v2514_v21  ;;  %v771_v36 = vadd.f32 %v739_v57, %v575_v23 }
 0x17d   : > { %v673_v12 = vpop.permute.xlu1 %672 }
 0x17e   : > { %v740_v30 = vmul.f32 %v2947_v32, %v673_v12 }
 0x17f   : > { %2403 = vmatpush3.bf16.msra.mxu1 %v2514_v21 }
 0x180   : > { %v772_v48 = vadd.f32 %v740_v30, %v576_v16 }
 0x182   : > { %v509_v46 = vpop.permute.xlu1 %508  ;;  %v968_v53 = vadd.f32 %v936_v19, %v772_v48 }
 0x183   : > { %v578_v25 = vmul.f32 %v2943_v31, %v509_v46 }
 0x187   : > { %v681_v2 = vpop.permute.xlu1 %680 }
 0x188   : > { %v742_v14 = vmul.f32 %v2947_v32, %v681_v2  ;;  %v1077_v2 = vpop.permute.xlu0 %1076 }
 0x189   : > { %v1135_v57 = vmul.f32 %v3055_v44, %v1077_v2 }
 0x18a   : > { %v774_v15 = vadd.f32 %v742_v14, %v578_v25 }
 0x18c   : > { %v865_v7 = vpop.permute.xlu1 %864  ;;  %v1089_v25 = vpop.permute.xlu0 %1088 }
 0x18d   : > { %v935_v24 = vmul.f32 %v3045_v22, %v865_v7 }
 0x18f   : > { %v967_v28 = vadd.f32 %v935_v24, %v771_v36 }
 0x190   : > { %v873_v39 = vpop.permute.xlu1 %872 }
 0x191   : > { %v1163_v47 = vadd.f32 %v1131_v11, %v967_v28  ;;  %v937_v63 = vmul.f32 %v3045_v22, %v873_v39  ;;  %v1138_v11 = vmul.f32 %v3055_v44, %v1089_v25 }
 0x193   : > { %v1202_v26 = vadd.f32 %v3096_v38, %v1163_v47  ;;  %v969_v4 = vadd.f32 %v937_v63, %v4050_v41 }
 0x194   : > { %v877_v50 = vpop.permute.xlu1 %876 }
 0x195   : > { %v938_v27 = vmul.f32 %v3045_v22, %v877_v50  ;;  %v1234_v37 = vmax.f32 %v1202_v26, 0.0 }
 0x197   : > { %v970_v13 = vadd.f32 %v938_v27, %v774_v15 }
 0x199   : > { %v1065_v54 = vpop.permute.xlu1 %1064  ;;  %v1166_v51 = vadd.f32 %v1134_v18, %v970_v13  ;;  %v4053_v18 = vld [vmem:[#allocation14_spill] sm:$0xff] }
 0x19a   : > { %v1132_v5 = vmul.f32 %v3055_v44, %v1065_v54 }
 0x19b   : > { %v1205_v6 = vadd.f32 %v3096_v38, %v1166_v51 }
 0x19c   : > { %v1164_v59 = vadd.f32 %v1132_v5, %v968_v53 }
 0x19d   : > { %v1069_v55 = vpop.permute.xlu1 %1068  ;;  %v1237_v34 = vmax.f32 %v1205_v6, 0.0 }
 0x19e   : > { %v1203_v42 = vadd.f32 %v3096_v38, %v1164_v59  ;;  %v1133_v33 = vmul.f32 %v3055_v44, %v1069_v55 }
 0x1a0   : > { %v1235_v9 = vmax.f32 %v1203_v42, 0.0  ;;  %v1165_v56 = vadd.f32 %v1133_v33, %v969_v4 }
 0x1a2   : > { %v1204_v35 = vadd.f32 %v3096_v38, %v1165_v56  ;;  %v514_v3 = vpop.permute.xlu1 %513  ;;  %v1256_v43 = vpack.c.bf16 %v1235_v9, %v1234_v37 }
 0x1a3   : > { %v579_v30 = vmul.f32 %v2943_v31, %v514_v3 }
 0x1a4   : > { %v1236_v1 = vmax.f32 %v1204_v35, 0.0  ;;  %2376 = vmatprep.mubr.bf16.mxu0 %v1256_v43  ;;  %v4054_v35 = vld [vmem:[#allocation8_spill] sm:$0xff] }
 0x1a5   : > { %v584_v3 = vmul.f32 %v2943_v31, %v4054_v35 }
 0x1a6   : > { %v1257_v8 = vpack.c.bf16 %v1237_v34, %v1236_v1  ;;  %v944_v34 = vmul.f32 %v3045_v22, %v3064_v0 }
 0x1a7   : > { %v685_v58 = vpop.permute.xlu1 %684 }
 0x1a8   : > { %2377 = vmatmul.mubr.bf16.gmra.mrb[20].mxu0 %v1257_v8  ;;  %v743_v19 = vmul.f32 %v2947_v32, %v685_v58 }
 0x1aa   : > { %v775_v46 = vadd.f32 %v743_v19, %v579_v30 }
 0x1ab   : > { %v689_v49 = vpop.permute.xlu1 %688 }
 0x1ac   : > { %v744_v10 = vmul.f32 %v2947_v32, %v689_v49 }
 0x1ae   : > { %v776_v12 = vadd.f32 %v744_v10, %v580_v40 }
 0x1b0   : > { %v529_v60 = vpop.permute.xlu1 %528  ;;  %v972_v62 = vadd.f32 %v940_v61, %v776_v12  ;;  %v1093_v12 = vpop.permute.xlu0 %1092 }
 0x1b1   : > { %v582_v7 = vmul.f32 %v2943_v31, %v529_v60  ;;  %v1139_v30 = vmul.f32 %v3055_v44, %v1093_v12 }
 0x1b5   : > { %v697_v16 = vpop.permute.xlu1 %696 }
 0x1b6   : > { %v746_v53 = vmul.f32 %v2947_v32, %v697_v16 }
 0x1b8   : > { %v778_v52 = vadd.f32 %v746_v53, %v582_v7 }
 0x1ba   : > { %v881_v29 = vpop.permute.xlu1 %880 }
 0x1bb   : > { %v939_v48 = vmul.f32 %v3045_v22, %v881_v29 }
 0x1bd   : > { %v971_v23 = vadd.f32 %v939_v48, %v775_v46 }
 0x1be   : > { %v889_v21 = vpop.permute.xlu1 %888 }
 0x1bf   : > { %v1167_v36 = vadd.f32 %v1135_v57, %v971_v23  ;;  %v941_v50 = vmul.f32 %v3045_v22, %v889_v21  ;;  %v1105_v21 = vpop.permute.xlu0 %1104 }
 0x1c0   : > { %v1142_v7 = vmul.f32 %v3055_v44, %v1105_v21 }
 0x1c1   : > { %v1206_v47 = vadd.f32 %v3096_v38, %v1167_v36  ;;  %v973_v54 = vadd.f32 %v941_v50, %v4053_v18 }
 0x1c2   : > { %v893_v24 = vpop.permute.xlu1 %892 }
 0x1c3   : > { %v942_v39 = vmul.f32 %v3045_v22, %v893_v24  ;;  %v1238_v59 = vmax.f32 %v1206_v47, 0.0 }
 0x1c5   : > { %v974_v14 = vadd.f32 %v942_v39, %v778_v52  ;;  %v4055_v52 = vld [vmem:[#allocation15_spill] sm:$0xff] }
 0x1c7   : > { %v1081_v28 = vpop.permute.xlu1 %1080  ;;  %v1170_v45 = vadd.f32 %v1138_v11, %v974_v14 }
 0x1c8   : > { %v1136_v27 = vmul.f32 %v3055_v44, %v1081_v28  ;;  %v3330_v28 = vld [vmem:[%s3962_s4] ss:$0 sm:$0xff] }
 0x1c9   : > { %v1209_v55 = vadd.f32 %v3096_v38, %v1170_v45 }
 0x1ca   : > { %v1168_v15 = vadd.f32 %v1136_v27, %v972_v62 }
 0x1cb   : > { %v1085_v13 = vpop.permute.xlu1 %1084  ;;  %v1241_v37 = vmax.f32 %v1209_v55, 0.0 }
 0x1cc   : > { %v1207_v63 = vadd.f32 %v3096_v38, %v1168_v15  ;;  %v1137_v5 = vmul.f32 %v3055_v44, %v1085_v13 }
 0x1ce   : > { %v1239_v26 = vmax.f32 %v1207_v63, 0.0  ;;  %v1169_v51 = vadd.f32 %v1137_v5, %v973_v54 }
 0x1d0   : > { %v1208_v41 = vadd.f32 %v3096_v38, %v1169_v51  ;;  %v534_v4 = vpop.permute.xlu1 %533  ;;  %v1258_v42 = vpack.c.bf16 %v1239_v26, %v1238_v59 }
 0x1d1   : > { %v583_v10 = vmul.f32 %v2943_v31, %v534_v4 }
 0x1d2   : > { %v1240_v33 = vmax.f32 %v1208_v41, 0.0  ;;  %2380 = vmatprep.mubr.bf16.mxu0 %v1258_v42 }
 0x1d4   : > { %v1259_v6 = vpack.c.bf16 %v1241_v37, %v1240_v33 }
 0x1d5   : > { %v701_v9 = vpop.permute.xlu1 %700 }
 0x1d6   : > { %2381 = vmatmul.mubr.bf16.gmra.mrb[24].mxu0 %v1259_v6  ;;  %v747_v40 = vmul.f32 %v2947_v32, %v701_v9 }
 0x1d8   : > { %v779_v60 = vadd.f32 %v747_v40, %v583_v10 }
 0x1d9   : > { %v705_v56 = vpop.permute.xlu1 %704 }
 0x1da   : > { %v748_v43 = vmul.f32 %v2947_v32, %v705_v56 }
 0x1dc   : > { %v780_v1 = vadd.f32 %v748_v43, %v584_v3 }
 0x1de   : > { %v549_v8 = vpop.permute.xlu1 %548  ;;  %v976_v58 = vadd.f32 %v944_v34, %v780_v1 }
 0x1df   : > { %v586_v16 = vmul.f32 %v2943_v31, %v549_v8 }
 0x1e3   : > { %v713_v49 = vpop.permute.xlu1 %712 }
 0x1e4   : > { %v750_v62 = vmul.f32 %v2947_v32, %v713_v49 }
 0x1e6   : > { %v782_v48 = vadd.f32 %v750_v62, %v586_v16 }
 0x1e8   : > { %v897_v20 = vpop.permute.xlu1 %896 }
 0x1e9   : > { %v943_v17 = vmul.f32 %v3045_v22, %v897_v20 }
 0x1eb   : > { %v975_v29 = vadd.f32 %v943_v17, %v779_v60 }
 0x1ec   : > { %v905_v61 = vpop.permute.xlu1 %904 }
 0x1ed   : > { %v1171_v46 = vadd.f32 %v1139_v30, %v975_v29  ;;  %v945_v57 = vmul.f32 %v3045_v22, %v905_v61 }
 0x1ef   : > { %v1210_v31 = vadd.f32 %v3096_v38, %v1171_v46  ;;  %v977_v36 = vadd.f32 %v945_v57, %v4055_v52 }
 0x1f0   : > { %v909_v0 = vpop.permute.xlu1 %908 }
 0x1f1   : > { %v946_v19 = vmul.f32 %v3045_v22, %v909_v0  ;;  %v1242_v27 = vmax.f32 %v1210_v31, 0.0 }
 0x1f3   : > { %v978_v53 = vadd.f32 %v946_v19, %v782_v48 }
 0x1f5   : > { %v1097_v2 = vpop.permute.xlu1 %1096  ;;  %v1174_v32 = vadd.f32 %v1142_v7, %v978_v53 }
 0x1f6   : > { %v1140_v23 = vmul.f32 %v3055_v44, %v1097_v2 }
 0x1f7   : > { %v1213_v45 = vadd.f32 %v3096_v38, %v1174_v32 }
 0x1f8   : > { %v1172_v24 = vadd.f32 %v1140_v23, %v976_v58 }
 0x1f9   : > { %v1101_v39 = vpop.permute.xlu1 %1100  ;;  %v1245_v59 = vmax.f32 %v1213_v45, 0.0 }
 0x1fa   : > { %v1211_v14 = vadd.f32 %v3096_v38, %v1172_v24  ;;  %v1141_v25 = vmul.f32 %v3055_v44, %v1101_v39 }
 0x1fc   : > { %v1243_v11 = vmax.f32 %v1211_v14, 0.0  ;;  %v1173_v22 = vadd.f32 %v1141_v25, %v977_v36  ;;  %v2358_v50 = vpop.f32.mrb[0].mxu0 }
 0x1fd   : > { %v1376_v15 = vadd.f32 %v2358_v50, %v3330_v28  ;;  %v1367_v47 = vpop.f32.mrb[1].mxu0 }
 0x1fe   : > { %v1212_v13 = vadd.f32 %v3096_v38, %v1173_v22  ;;  %v1368_v18 = vadd.f32 %v3330_v28, %v1367_v47  ;;  %v2359_v54 = vpop.f32.mrb[2].mxu0  ;;  %v1260_v44 = vpack.c.bf16 %v1243_v11, %v1242_v27 }
 0x1ff   : > { %v1379_v63 = vadd.f32 %v2359_v54, %v3330_v28  ;;  %v1370_v5 = vpop.f32.mrb[3].mxu0  ;;  %v1496_v55 = vmax.f32 %v1376_v15, 0.0 }
 0x200   : > { %v1244_v26 = vmax.f32 %v1212_v13, 0.0  ;;  %v1371_v51 = vadd.f32 %v3330_v28, %v1370_v5  ;;  %2384 = vmatprep.mubr.bf16.mxu0 %v1260_v44  ;;  %v1494_v4 = vmax.f32 %v1368_v18, 0.0 }
 0x201   : > { %v1497_v41 = vmax.f32 %v1379_v63, 0.0 }
 0x202   : > { %v1495_v42 = vmax.f32 %v1371_v51, 0.0  ;;  %v1261_v33 = vpack.c.bf16 %v1245_v59, %v1244_v26 }
 0x203   : > { %v1527_v37 = vpack.c.bf16 %v1497_v41, %v1496_v55 }
 0x204   : > { %v2362_v6 = vpop.f32.mrb[4].mxu0  ;;  %2385 = vmatmul.mubr.bf16.gmra.mrb[28].mxu0 %v1261_v33  ;;  %v1526_v38 = vpack.c.bf16 %v1495_v42, %v1494_v4 }
 0x205   : > { %v1392_v9 = vadd.f32 %v2362_v6, %v3330_v28  ;;  %v1383_v56 = vpop.f32.mrb[5].mxu0 }
 0x206   : > { %v1384_v35 = vadd.f32 %v3330_v28, %v1383_v56  ;;  %v2363_v3 = vpop.f32.mrb[6].mxu0  ;;  %2404 = vmatprep.mubr.bf16.mxu1 %v1526_v38 }
 0x207   : > { %v1395_v43 = vadd.f32 %v2363_v3, %v3330_v28  ;;  %v1386_v34 = vpop.f32.mrb[7].mxu0  ;;  %2405 = vmatmul.mubr.bf16.vlgmr.msra.gmra.mrb[0].mxu1 %v1527_v37  ;;  %v1500_v8 = vmax.f32 %v1392_v9, 0.0 }
 0x208   : > { %v1387_v1 = vadd.f32 %v3330_v28, %v1386_v34  ;;  %v1498_v49 = vmax.f32 %v1384_v35, 0.0 }
 0x209   : > { %v1501_v58 = vmax.f32 %v1395_v43, 0.0 }
 0x20a   : > { %v1499_v20 = vmax.f32 %v1387_v1, 0.0 }
 0x20b   : > { %v1529_v40 = vpack.c.bf16 %v1501_v58, %v1500_v8 }
 0x20c   : > { %v1528_v10 = vpack.c.bf16 %v1499_v20, %v1498_v49  ;;  %v2366_v17 = vpop.f32.mrb[8].mxu0 }
 0x20d   : > { %v1408_v61 = vadd.f32 %v2366_v17, %v3330_v28  ;;  %v1399_v12 = vpop.f32.mrb[9].mxu0 }
 0x20e   : > { %v1400_v60 = vadd.f32 %v3330_v28, %v1399_v12  ;;  %v2367_v62 = vpop.f32.mrb[10].mxu0  ;;  %2408 = vmatprep.mubr.bf16.mxu1 %v1528_v10 }
 0x20f   : > { %v1411_v16 = vadd.f32 %v2367_v62, %v3330_v28  ;;  %v1402_v29 = vpop.f32.mrb[11].mxu0  ;;  %2409 = vmatmul.mubr.bf16.gmra.mrb[4].mxu1 %v1529_v40  ;;  %v1504_v19 = vmax.f32 %v1408_v61, 0.0 }
 0x210   : > { %v1403_v0 = vadd.f32 %v3330_v28, %v1402_v29  ;;  %v1502_v48 = vmax.f32 %v1400_v60, 0.0 }
 0x211   : > { %v1505_v30 = vmax.f32 %v1411_v16, 0.0 }
 0x212   : > { %v1503_v21 = vmax.f32 %v1403_v0, 0.0 }
 0x213   : > { %v1531_v46 = vpack.c.bf16 %v1505_v30, %v1504_v19 }
 0x214   : > { %v1530_v53 = vpack.c.bf16 %v1503_v21, %v1502_v48  ;;  %v3366_v48 = vld [vmem:[%s3964_s6] ss:$0 sm:$0xff] }
 0x216   : > { %2412 = vmatprep.mubr.bf16.mxu1 %v1530_v53 }
 0x217   : > { %2413 = vmatmul.mubr.bf16.gmra.mrb[8].mxu1 %v1531_v46 }
 0x21f   : > { %v2370_v2 = vpop.f32.mrb[12].mxu0 }
 0x220   : > { %v1424_v7 = vadd.f32 %v2370_v2, %v3330_v28  ;;  %v1415_v57 = vpop.f32.mrb[13].mxu0 }
 0x221   : > { %v1416_v23 = vadd.f32 %v3330_v28, %v1415_v57  ;;  %v2371_v32 = vpop.f32.mrb[14].mxu0 }
 0x222   : > { %v1427_v24 = vadd.f32 %v2371_v32, %v3330_v28  ;;  %v1418_v31 = vpop.f32.mrb[15].mxu0  ;;  %v1508_v52 = vmax.f32 %v1424_v7, 0.0 }
 0x223   : > { %v1419_v39 = vadd.f32 %v3330_v28, %v1418_v31  ;;  %v1506_v14 = vmax.f32 %v1416_v23, 0.0 }
 0x224   : > { %v1509_v36 = vmax.f32 %v1427_v24, 0.0 }
 0x225   : > { %v1507_v25 = vmax.f32 %v1419_v39, 0.0 }
 0x226   : > { %v1533_v11 = vpack.c.bf16 %v1509_v36, %v1508_v52 }
 0x227   : > { %v1532_v22 = vpack.c.bf16 %v1507_v25, %v1506_v14 }
 0x229   : > { %2416 = vmatprep.mubr.bf16.mxu1 %v1532_v22 }
 0x22a   : > { %2417 = vmatmul.mubr.bf16.gmra.mrb[12].mxu1 %v1533_v11 }
 0x24d   : > { %v2374_v50 = vpop.f32.mrb[16].mxu0 }
 0x24e   : > { %v1440_v27 = vadd.f32 %v2374_v50, %v3330_v28  ;;  %v1431_v45 = vpop.f32.mrb[17].mxu0 }
 0x24f   : > { %v1432_v15 = vadd.f32 %v3330_v28, %v1431_v45  ;;  %v2375_v47 = vpop.f32.mrb[18].mxu0 }
 0x250   : > { %v1443_v13 = vadd.f32 %v2375_v47, %v3330_v28  ;;  %v1434_v18 = vpop.f32.mrb[19].mxu0  ;;  %v1512_v44 = vmax.f32 %v1440_v27, 0.0 }
 0x251   : > { %v1435_v54 = vadd.f32 %v3330_v28, %v1434_v18  ;;  %v1510_v5 = vmax.f32 %v1432_v15, 0.0 }
 0x252   : > { %v1513_v63 = vmax.f32 %v1443_v13, 0.0 }
 0x253   : > { %v1511_v26 = vmax.f32 %v1435_v54, 0.0 }
 0x254   : > { %v1535_v51 = vpack.c.bf16 %v1513_v63, %v1512_v44 }
 0x255   : > { %v1534_v59 = vpack.c.bf16 %v1511_v26, %v1510_v5 }
 0x257   : > { %2420 = vmatprep.mubr.bf16.mxu1 %v1534_v59 }
 0x258   : > { %2421 = vmatmul.mubr.bf16.gmra.mrb[16].mxu1 %v1535_v51 }
 0x27b   : > { %v2378_v55 = vpop.f32.mrb[20].mxu0 }
 0x27c   : > { %v1456_v41 = vadd.f32 %v2378_v55, %v3330_v28  ;;  %v1447_v4 = vpop.f32.mrb[21].mxu0 }
 0x27d   : > { %v1448_v42 = vadd.f32 %v3330_v28, %v1447_v4  ;;  %v2379_v33 = vpop.f32.mrb[22].mxu0 }
 0x27e   : > { %v1459_v37 = vadd.f32 %v2379_v33, %v3330_v28  ;;  %v1450_v6 = vpop.f32.mrb[23].mxu0  ;;  %v1516_v9 = vmax.f32 %v1456_v41, 0.0 }
 0x27f   : > { %v1451_v38 = vadd.f32 %v3330_v28, %v1450_v6  ;;  %v1514_v35 = vmax.f32 %v1448_v42, 0.0 }
 0x280   : > { %v1517_v56 = vmax.f32 %v1459_v37, 0.0 }
 0x281   : > { %v1515_v3 = vmax.f32 %v1451_v38, 0.0 }
 0x282   : > { %v1537_v43 = vpack.c.bf16 %v1517_v56, %v1516_v9 }
 0x283   : > { %v1536_v34 = vpack.c.bf16 %v1515_v3, %v1514_v35 }
 0x285   : > { %2424 = vmatprep.mubr.bf16.mxu1 %v1536_v34 }
 0x286   : > { %2425 = vmatmul.mubr.bf16.gmra.mrb[20].mxu1 %v1537_v43 }
 0x2a9   : > { %v2382_v1 = vpop.f32.mrb[24].mxu0 }
 0x2aa   : > { %v1472_v8 = vadd.f32 %v2382_v1, %v3330_v28  ;;  %v1463_v58 = vpop.f32.mrb[25].mxu0 }
 0x2ab   : > { %v1464_v49 = vadd.f32 %v3330_v28, %v1463_v58  ;;  %v2383_v20 = vpop.f32.mrb[26].mxu0 }
 0x2ac   : > { %v1475_v40 = vadd.f32 %v2383_v20, %v3330_v28  ;;  %v1466_v10 = vpop.f32.mrb[27].mxu0  ;;  %v1520_v61 = vmax.f32 %v1472_v8, 0.0 }
 0x2ad   : > { %v1467_v17 = vadd.f32 %v3330_v28, %v1466_v10  ;;  %v1518_v60 = vmax.f32 %v1464_v49, 0.0 }
 0x2ae   : > { %v1521_v12 = vmax.f32 %v1475_v40, 0.0 }
 0x2af   : > { %v1519_v62 = vmax.f32 %v1467_v17, 0.0 }
 0x2b0   : > { %v1539_v16 = vpack.c.bf16 %v1521_v12, %v1520_v61 }
 0x2b1   : > { %v1538_v29 = vpack.c.bf16 %v1519_v62, %v1518_v60 }
 0x2b3   : > { %2428 = vmatprep.mubr.bf16.mxu1 %v1538_v29 }
 0x2b4   : > { %2429 = vmatmul.mubr.bf16.gmra.mrb[24].mxu1 %v1539_v16 }
 0x2d7   : > { %v2386_v0 = vpop.f32.mrb[28].mxu0 }
 0x2d8   : > { %v1488_v19 = vadd.f32 %v2386_v0, %v3330_v28  ;;  %v1479_v30 = vpop.f32.mrb[29].mxu0 }
 0x2d9   : > { %v1480_v21 = vadd.f32 %v3330_v28, %v1479_v30  ;;  %v2387_v46 = vpop.f32.mrb[30].mxu0 }
 0x2da   : > { %v1491_v53 = vadd.f32 %v2387_v46, %v3330_v28  ;;  %v1482_v2 = vpop.f32.mrb[31].mxu0  ;;  %v2406_v7 = vpop.f32.mrb[0].mxu1  ;;  %v1524_v24 = vmax.f32 %v1488_v19, 0.0 }
 0x2db   : > { %v1483_v57 = vadd.f32 %v3330_v28, %v1482_v2  ;;  %v3379_v23 = vadd.f32 %v2406_v7, %v3366_v48  ;;  %v1647_v32 = vpop.f32.mrb[1].mxu1  ;;  %v1522_v36 = vmax.f32 %v1480_v21, 0.0  ;;  %v4056_v7 = vld [vmem:[#allocation7_spill] sm:$0xff] }
 0x2dc   : > { %v1525_v31 = vmax.f32 %v1491_v53, 0.0  ;;  %v3382_v39 = vadd.f32 %v3366_v48, %v1647_v32  ;;  %v2407_v52 = vpop.f32.mrb[2].mxu1  ;;  %v3520_v32 = vstv %s2289_s11 }
 0x2dd   : > { %v1523_v14 = vmax.f32 %v1483_v57, 0.0  ;;  %1776 = vst [vmem:[%s3375_s24 + $0x10] sm:$0xff] %v3379_v23  ;;  %v3387_v25 = vadd.f32 %v2407_v52, %v3366_v48  ;;  %v1650_v28 = vpop.f32.mrb[3].mxu1  ;;  %v1810_v57 = vadd.s32 16, %v4056_v7  ;;  %v1814_v52 = vadd.s32 48, %v4056_v7 }
 0x2de   : > { %v1541_v11 = vpack.c.bf16 %v1525_v31, %v1524_v24  ;;  %1774 = vst [vmem:[%s3375_s24] sm:$0xff] %v3382_v39  ;;  %v3392_v22 = vadd.f32 %v3366_v48, %v1650_v28  ;;  %v1811_v24 = vadd.s32 24, %v4056_v7  ;;  %v1809_v31 = vadd.s32 8, %v4056_v7 }
 0x2df   : > { %v1540_v50 = vpack.c.bf16 %v1523_v14, %v1522_v36  ;;  %1777 = vst [vmem:[%s3375_s24 + $0x18] sm:$0xff] %v3387_v25  ;;  %v1812_v36 = vadd.s32 32, %v4056_v7  ;;  %v1815_v14 = vadd.s32 56, %v4056_v7  ;;  %v1813_v28 = vadd.s32 40, %v4056_v7 }
 0x2e0   : > { %1775 = vst [vmem:[%s3375_s24 + $0x8] sm:$0xff] %v3392_v22 }
 0x2e1   : > { %2432 = vmatprep.mubr.bf16.mxu1 %v1540_v50  ;;  %v3533_v50 = vadd.s32 %v3520_v32, %v4056_v7 }
 0x2e2   : > { %v2410_v27 = vpop.f32.mrb[4].mxu1  ;;  %2433 = vmatmul.mubr.bf16.gmra.mrb[28].mxu1 %v1541_v11  ;;  %v3529_v11 = vadd.s32 %v3520_v32, %v1810_v57 }
 0x2e3   : > { %v3399_v45 = vadd.f32 %v2410_v27, %v3366_v48  ;;  %v1663_v15 = vpop.f32.mrb[5].mxu1  ;;  %4058 = vst [vmem:[#allocation4_spill] sm:$0xff] %v3533_v50  ;;  %v3536_v27 = vadd.s32 %v3520_v32, %v1811_v24  ;;  %vm1873_vm1 = vcmp.lt.s32.totalorder %v3533_v50, 512 }
 0x2e4   : > { %v3402_v47 = vadd.f32 %v3366_v48, %v1663_v15  ;;  %v2411_v13 = vpop.f32.mrb[6].mxu1  ;;  %4057 = vst [vmem:[#allocation11_spill] sm:$0xff] %v3529_v11  ;;  %v3539_v15 = vadd.s32 %v3520_v32, %v1809_v31  ;;  %vm3997_vm0 = vcmp.lt.s32.totalorder %v3529_v11, 512 }
 0x2e5   : > { %1780 = vst [vmem:[%s3375_s24 + $0x30] sm:$0xff] %v3399_v45  ;;  %v3407_v18 = vadd.f32 %v2411_v13, %v3366_v48  ;;  %v1666_v54 = vpop.f32.mrb[7].mxu1  ;;  %4059 = vst [vmem:[#allocation16_spill] sm:$0xff] %v3536_v27  ;;  %v3542_v13 = vadd.s32 %v3520_v32, %v1814_v52  ;;  %vm3996_vm2 = vcmp.lt.s32.totalorder %v3536_v27, 512  ;;  %v1830_v52 = vadd.s32 176, %v4056_v7 }
 0x2e6   : > { %1778 = vst [vmem:[%s3375_s24 + $0x20] sm:$0xff] %v3402_v47  ;;  %v3412_v44 = vadd.f32 %v3366_v48, %v1666_v54  ;;  %4060 = vst [vmem:[#allocation9_spill] sm:$0xff] %v3539_v15  ;;  %v3545_v54 = vadd.s32 %v3520_v32, %v1812_v36  ;;  %vm3998_vm3 = vcmp.lt.s32.totalorder %v3539_v15, 512  ;;  %v1836_v15 = vadd.s32 224, %v4056_v7 }
 0x2e7   : > { %1781 = vst [vmem:[%s3375_s24 + $0x38] sm:$0xff] %v3407_v18  ;;  %4061 = vst [vmem:[#allocation2_spill] sm:$0xff] %v3542_v13  ;;  %vm3986_vm4 = vcmp.lt.s32.totalorder %v3542_v13, 512 }
 0x2e8   : > { %1779 = vst [vmem:[%s3375_s24 + $0x28] sm:$0xff] %v3412_v44  ;;  %4062 = vst [vmem:[#allocation10_spill] sm:$0xff] %v3545_v54  ;;  %vm3992_vm5 = vcmp.lt.s32.totalorder %v3545_v54, 512 }
 0x2ea   : > { %v2414_v63 = vpop.f32.mrb[8].mxu1 }
 0x2eb   : > { %v3419_v5 = vadd.f32 %v2414_v63, %v3366_v48  ;;  %v1679_v26 = vpop.f32.mrb[9].mxu1  ;;  %v3548_v63 = vadd.s32 %v3520_v32, %v1815_v14 }
 0x2ec   : > { %v3422_v51 = vadd.f32 %v3366_v48, %v1679_v26  ;;  %v2415_v59 = vpop.f32.mrb[10].mxu1  ;;  %v3551_v26 = vadd.s32 %v3520_v32, %v1813_v28  ;;  %v1828_v28 = vadd.s32 160, %v4056_v7 }
 0x2ed   : > { %1784 = vst [vmem:[%s3375_s24 + $0x50] sm:$0xff] %v3419_v5  ;;  %v3427_v55 = vadd.f32 %v2415_v59, %v3366_v48  ;;  %v1682_v41 = vpop.f32.mrb[11].mxu1  ;;  %4063 = vst [vmem:[#allocation3_spill] sm:$0xff] %v3548_v63  ;;  %v1818_v59 = vadd.s32 80, %v4056_v7  ;;  %vm3988_vm6 = vcmp.lt.s32.totalorder %v3548_v63, 512 }
 0x2ee   : > { %1782 = vst [vmem:[%s3375_s24 + $0x40] sm:$0xff] %v3422_v51  ;;  %v3432_v4 = vadd.f32 %v3366_v48, %v1682_v41  ;;  %4064 = vst [vmem:[#allocation12_spill] sm:$0xff] %v3551_v26  ;;  %v1816_v41 = vadd.s32 64, %v4056_v7  ;;  %vm3990_vm7 = vcmp.lt.s32.totalorder %v3551_v26, 512 }
 0x2ef   : > { %1785 = vst [vmem:[%s3375_s24 + $0x58] sm:$0xff] %v3427_v55 }
 0x2f0   : > { %1783 = vst [vmem:[%s3375_s24 + $0x48] sm:$0xff] %v3432_v4 }
 0x2fd   : > { %v2418_v42 = vpop.f32.mrb[12].mxu1 }
 0x2fe   : > { %v3439_v33 = vadd.f32 %v2418_v42, %v3366_v48  ;;  %v1695_v37 = vpop.f32.mrb[13].mxu1  ;;  %v1819_v42 = vadd.s32 88, %v4056_v7 }
 0x2ff   : > { %v3442_v6 = vadd.f32 %v3366_v48, %v1695_v37  ;;  %v2419_v38 = vpop.f32.mrb[14].mxu1  ;;  %v1817_v37 = vadd.s32 72, %v4056_v7 }
 0x300   : > { %1788 = vst [vmem:[%s3375_s24 + $0x70] sm:$0xff] %v3439_v33  ;;  %v3447_v9 = vadd.f32 %v2419_v38, %v3366_v48  ;;  %v1698_v56 = vpop.f32.mrb[15].mxu1  ;;  %v1822_v38 = vadd.s32 112, %v4056_v7 }
 0x301   : > { %1786 = vst [vmem:[%s3375_s24 + $0x60] sm:$0xff] %v3442_v6  ;;  %v3452_v35 = vadd.f32 %v3366_v48, %v1698_v56  ;;  %v1820_v56 = vadd.s32 96, %v4056_v7 }
 0x302   : > { %1789 = vst [vmem:[%s3375_s24 + $0x78] sm:$0xff] %v3447_v9 }
 0x303   : > { %1787 = vst [vmem:[%s3375_s24 + $0x68] sm:$0xff] %v3452_v35 }
 0x32b   : > { %v2422_v3 = vpop.f32.mrb[16].mxu1 }
 0x32c   : > { %v3459_v43 = vadd.f32 %v2422_v3, %v3366_v48  ;;  %v1711_v34 = vpop.f32.mrb[17].mxu1  ;;  %v1823_v3 = vadd.s32 120, %v4056_v7 }
 0x32d   : > { %v3462_v1 = vadd.f32 %v3366_v48, %v1711_v34  ;;  %v2423_v8 = vpop.f32.mrb[18].mxu1  ;;  %v1821_v34 = vadd.s32 104, %v4056_v7 }
 0x32e   : > { %1792 = vst [vmem:[%s3375_s24 + $0x90] sm:$0xff] %v3459_v43  ;;  %v3467_v58 = vadd.f32 %v2423_v8, %v3366_v48  ;;  %v1714_v49 = vpop.f32.mrb[19].mxu1  ;;  %v1826_v8 = vadd.s32 144, %v4056_v7  ;;  %v3592_v57 = vadd.s32 %v3520_v32, %v1823_v3 }
 0x32f   : > { %1790 = vst [vmem:[%s3375_s24 + $0x80] sm:$0xff] %v3462_v1  ;;  %v3472_v20 = vadd.f32 %v3366_v48, %v1714_v49  ;;  %v1824_v49 = vadd.s32 128, %v4056_v7  ;;  %v3595_v24 = vadd.s32 %v3520_v32, %v1821_v34  ;;  %v1909_v34 = vsel %vm3992_vm5, %v3402_v47, -inf }
 0x330   : > { %1793 = vst [vmem:[%s3375_s24 + $0x98] sm:$0xff] %v3467_v58  ;;  %4070 = vst [vmem:[#allocation14_spill] sm:$0xff] %v3592_v57  ;;  %v3598_v31 = vadd.s32 %v3520_v32, %v1826_v8  ;;  %vm4013_vm14 = vcmp.lt.s32.totalorder %v3592_v57, 512  ;;  %v1912_v8 = vsel %vm3988_vm6, %v3407_v18, -inf }
 0x331   : > { %1791 = vst [vmem:[%s3375_s24 + $0x88] sm:$0xff] %v3472_v20  ;;  %4071 = vst [vmem:[#allocation8_spill] sm:$0xff] %v3595_v24  ;;  %v3602_v36 = vadd.s32 %v3520_v32, %v1824_v49  ;;  %vm1886_vm15 = vcmp.lt.s32.totalorder %v3595_v24, 512  ;;  %v1910_v49 = vsel %vm3990_vm7, %v3412_v44, -inf }
 0x332   : > { %vm4009_vm8 = vcmp.lt.s32.totalorder %v3598_v31, 512 }
 0x333   : > { %vm4011_vm10 = vcmp.lt.s32.totalorder %v3602_v36, 512  ;;  %v1923_v24 = vsel %vm4009_vm8, %v3459_v43, -inf }
 0x359   : > { %v2426_v40 = vpop.f32.mrb[20].mxu1 }
 0x35a   : > { %v3479_v10 = vadd.f32 %v2426_v40, %v3366_v48  ;;  %v1727_v17 = vpop.f32.mrb[21].mxu1  ;;  %v1827_v40 = vadd.s32 152, %v4056_v7 }
 0x35b   : > { %v3482_v61 = vadd.f32 %v3366_v48, %v1727_v17  ;;  %v2427_v12 = vpop.f32.mrb[22].mxu1  ;;  %v3573_v17 = vadd.s32 %v3520_v32, %v1818_v59  ;;  %v1831_v59 = vadd.s32 184, %v4056_v7 }
 0x35c   : > { %1796 = vst [vmem:[%s3375_s24 + $0xb0] sm:$0xff] %v3479_v10  ;;  %v3487_v60 = vadd.f32 %v2427_v12, %v3366_v48  ;;  %v1730_v62 = vpop.f32.mrb[23].mxu1  ;;  %v3576_v12 = vadd.s32 %v3520_v32, %v1816_v41  ;;  %v3605_v14 = vadd.s32 %v3520_v32, %v1827_v40 }
 0x35d   : > { %1794 = vst [vmem:[%s3375_s24 + $0xa0] sm:$0xff] %v3482_v61  ;;  %v3492_v16 = vadd.f32 %v3366_v48, %v1730_v62  ;;  %4065 = vst [vmem:[#allocation5_spill] sm:$0xff] %v3573_v17  ;;  %v1825_v62 = vadd.s32 136, %v4056_v7  ;;  %v3634_v3 = vadd.s32 %v3520_v32, %v1831_v59  ;;  %v1906_v59 = vsel %vm3998_vm3, %v3392_v22, -inf }
 0x35e   : > { %1797 = vst [vmem:[%s3375_s24 + $0xb8] sm:$0xff] %v3487_v60  ;;  %4066 = vst [vmem:[#allocation17_spill] sm:$0xff] %v3576_v12  ;;  %vm1881_vm9 = vcmp.lt.s32.totalorder %v3576_v12, 512  ;;  %vm4008_vm11 = vcmp.lt.s32.totalorder %v3605_v14, 512  ;;  %vm4072_vm6 = vcmp.lt.s32.totalorder %v3573_v17, 512  ;;  %v1938_v11 = vmax.f32 %v1906_v59, %v1910_v49 }
 0x35f   : > { %1795 = vst [vmem:[%s3375_s24 + $0xa8] sm:$0xff] %v3492_v16  ;;  %v3612_v41 = vadd.s32 %v3520_v32, %v1825_v62  ;;  %v1907_v62 = vsel %vm3997_vm0, %v3379_v23, -inf  ;;  %v1913_v13 = vsel %vm1881_vm9, %v3422_v51, -inf  ;;  %vm1896_vm0 = vcmp.lt.s32.totalorder %v3634_v3, 512 }
 0x360   : > { %v1835_v17 = vadd.s32 216, %v4056_v7  ;;  %v1838_v12 = vadd.s32 240, %v4056_v7 }
 0x387   : > { %v2430_v29 = vpop.f32.mrb[24].mxu1 }
 0x388   : > { %v3499_v0 = vadd.f32 %v2430_v29, %v3366_v48  ;;  %v1743_v19 = vpop.f32.mrb[25].mxu1  ;;  %v3580_v29 = vadd.s32 %v3520_v32, %v1819_v42  ;;  %v1829_v42 = vadd.s32 168, %v4056_v7 }
 0x389   : > { %v3502_v30 = vadd.f32 %v3366_v48, %v1743_v19  ;;  %v2431_v21 = vpop.f32.mrb[26].mxu1  ;;  %v3583_v19 = vadd.s32 %v3520_v32, %v1817_v37  ;;  %v3623_v37 = vadd.s32 %v3520_v32, %v1830_v52  ;;  %v1905_v52 = vsel %vm1873_vm1, %v3382_v39, -inf }
 0x38a   : > { %1800 = vst [vmem:[%s3375_s24 + $0xd0] sm:$0xff] %v3499_v0  ;;  %v3507_v46 = vadd.f32 %v2431_v21, %v3366_v48  ;;  %v1746_v53 = vpop.f32.mrb[27].mxu1  ;;  %4067 = vst [vmem:[#allocation13_spill] sm:$0xff] %v3580_v29  ;;  %v3586_v21 = vadd.s32 %v3520_v32, %v1822_v38  ;;  %v1911_v38 = vsel %vm3986_vm4, %v3399_v45, -inf  ;;  %vm4010_vm4 = vcmp.lt.s32.totalorder %v3612_v41, 512 }
 0x38b   : > { %1798 = vst [vmem:[%s3375_s24 + $0xc0] sm:$0xff] %v3502_v30  ;;  %v3512_v2 = vadd.f32 %v3366_v48, %v1746_v53  ;;  %4068 = vst [vmem:[#allocation6_spill] sm:$0xff] %v3583_v19  ;;  %v3589_v53 = vadd.s32 %v3520_v32, %v1820_v56  ;;  %v3631_v56 = vadd.s32 %v3520_v32, %v1828_v28  ;;  %v1908_v28 = vsel %vm3996_vm2, %v3387_v25, -inf }
 0x38c   : > { %1801 = vst [vmem:[%s3375_s24 + $0xd8] sm:$0xff] %v3507_v46  ;;  %4069 = vst [vmem:[#allocation18_spill] sm:$0xff] %v3586_v21  ;;  %vm1887_vm12 = vcmp.lt.s32.totalorder %v3586_v21, 512  ;;  %v3647_v40 = vadd.s32 %v3520_v32, %v1829_v42  ;;  %v1939_v63 = vmax.f32 %v1907_v62, %v1911_v38  ;;  %v1915_v42 = vsel %vm4072_vm6, %v3419_v5, -inf }
 0x38d   : > { %1799 = vst [vmem:[%s3375_s24 + $0xc8] sm:$0xff] %v3512_v2  ;;  %vm1885_vm13 = vcmp.lt.s32.totalorder %v3589_v53, 512  ;;  %vm4073_vm7 = vcmp.lt.s32.totalorder %v3580_v29, 512  ;;  %vm4012_vm5 = vcmp.lt.s32.totalorder %v3623_v37, 512  ;;  %v1937_v54 = vmax.f32 %v1905_v52, %v1909_v34 }
 0x38e   : > { %v1916_v26 = vsel %vm4073_vm7, %v3427_v55, -inf  ;;  %v1940_v27 = vmax.f32 %v1908_v28, %v1912_v8  ;;  %vm4074_vm2 = vcmp.lt.s32.totalorder %v3583_v19, 512  ;;  %vm1893_vm6 = vcmp.lt.s32.totalorder %v3631_v56, 512 }
 0x38f   : > { %v1914_v38 = vsel %vm4074_vm2, %v3432_v4, -inf  ;;  %vm1894_vm3 = vcmp.lt.s32.totalorder %v3647_v40, 512  ;;  %v1834_v62 = vadd.s32 208, %v4056_v7  ;;  %v1832_v29 = vadd.s32 192, %v4056_v7 }
 0x390   : > { %v1833_v34 = vadd.s32 200, %v4056_v7  ;;  %v1943_v8 = vmax.f32 %v1939_v63, %v1915_v42  ;;  %v1941_v49 = vmax.f32 %v1937_v54, %v1913_v13  ;;  %v1944_v52 = vmax.f32 %v1940_v27, %v1916_v26 }
 0x391   : > { %v1919_v28 = vsel %vm1887_vm12, %v3439_v33, -inf  ;;  %v1917_v59 = vsel %vm1885_vm13, %v3442_v6, -inf  ;;  %v1920_v19 = vsel %vm4013_vm14, %v3447_v9, -inf  ;;  %v1942_v50 = vmax.f32 %v1938_v11, %v1914_v38 }
 0x392   : > { %v1918_v27 = vsel %vm1886_vm15, %v3452_v35, -inf  ;;  %v1839_v13 = vadd.s32 248, %v4056_v7  ;;  %v1837_v54 = vadd.s32 232, %v4056_v7  ;;  %v3698_v63 = vadd.s32 %v3520_v32, %v1834_v62 }
 0x393   : > { %v3701_v26 = vadd.s32 %v3520_v32, %v1832_v29  ;;  %v3704_v42 = vadd.s32 %v3520_v32, %v1835_v17  ;;  %v3707_v57 = vadd.s32 %v3520_v32, %v1833_v34  ;;  %v1947_v11 = vmax.f32 %v1943_v8, %v1919_v28 }
 0x394   : > { %4075 = vst [vmem:[#allocation15_spill] sm:$0xff] %v3698_v63  ;;  %v1945_v38 = vmax.f32 %v1941_v49, %v1917_v59  ;;  %v1948_v21 = vmax.f32 %v1944_v52, %v1920_v19  ;;  %v1921_v7 = vsel %vm4011_vm10, %v3462_v1, -inf  ;;  %v1924_v29 = vsel %vm4008_vm11, %v3467_v58, -inf }
 0x395   : > { %4076 = vst [vmem:[#allocation7_spill] sm:$0xff] %v3704_v42  ;;  %4077 = vst [vmem:[#allocation19_spill] sm:$0xff] %v3707_v57  ;;  %v3719_v17 = vadd.s32 %v3520_v32, %v1838_v12  ;;  %v3722_v62 = vadd.s32 %v3520_v32, %v1836_v15  ;;  %v1946_v34 = vmax.f32 %v1942_v50, %v1918_v27  ;;  %v1922_v19 = vsel %vm4010_vm4, %v3472_v20, -inf }
 0x396   : > { %v3728_v8 = vadd.s32 %v3520_v32, %v1839_v13  ;;  %v3731_v49 = vadd.s32 %v3520_v32, %v1837_v54  ;;  %vm1899_vm2 = vcmp.lt.s32.totalorder %v3698_v63, 512  ;;  %vm1897_vm7 = vcmp.lt.s32.totalorder %v3701_v26, 512 }
 0x397   : > { %vm1900_vm11 = vcmp.lt.s32.totalorder %v3704_v42, 512  ;;  %vm1898_vm8 = vcmp.lt.s32.totalorder %v3707_v57, 512  ;;  %v1951_v15 = vmax.f32 %v1947_v11, %v1923_v24  ;;  %v1949_v50 = vmax.f32 %v1945_v38, %v1921_v7 }
 0x398   : > { %v1952_v12 = vmax.f32 %v1948_v21, %v1924_v29  ;;  %v1927_v52 = vsel %vm4012_vm5, %v3479_v10, -inf  ;;  %v1950_v28 = vmax.f32 %v1946_v34, %v1922_v19  ;;  %v1928_v32 = vsel %vm1896_vm0, %v3487_v60, -inf }
 0x399   : > { %vm4018_vm4 = vcmp.lt.s32.totalorder %v3719_v17, 512  ;;  %vm1901_vm10 = vcmp.lt.s32.totalorder %v3722_v62, 512  ;;  %v1925_v59 = vsel %vm1893_vm6, %v3482_v61, -inf  ;;  %v1926_v21 = vsel %vm1894_vm3, %v3492_v16, -inf }
 0x39a   : > { %vm4017_vm5 = vcmp.lt.s32.totalorder %v3728_v8, 512  ;;  %vm1902_vm14 = vcmp.lt.s32.totalorder %v3731_v49, 512  ;;  %v1955_v27 = vmax.f32 %v1951_v15, %v1927_v52  ;;  %v1931_v13 = vsel %vm1899_vm2, %v3499_v0, -inf }
 0x39b   : > { %v1932_v54 = vsel %vm1900_vm11, %v3507_v46, -inf  ;;  %v1956_v7 = vmax.f32 %v1952_v12, %v1928_v32  ;;  %v1929_v29 = vsel %vm1897_vm7, %v3502_v30, -inf  ;;  %v1930_v34 = vsel %vm1898_vm8, %v3512_v2, -inf }
 0x39c   : > { %v1953_v52 = vmax.f32 %v1949_v50, %v1925_v59  ;;  %v1954_v42 = vmax.f32 %v1950_v28, %v1926_v21  ;;  %v1959_v63 = vmax.f32 %v1955_v27, %v1931_v13 }
 0x39d   : > { %v1960_v57 = vmax.f32 %v1956_v7, %v1932_v54 }
 0x39e   : > { %v1957_v59 = vmax.f32 %v1953_v52, %v1929_v29  ;;  %v1958_v21 = vmax.f32 %v1954_v42, %v1930_v34 }
 0x3b5   : > { %v2434_v24 = vpop.f32.mrb[28].mxu1 }
 0x3b6   : > { %v3760_v11 = vadd.f32 %v2434_v24, %v3366_v48  ;;  %v1759_v38 = vpop.f32.mrb[29].mxu1 }
 0x3b7   : > { %v3769_v19 = vadd.f32 %v3366_v48, %v1759_v38  ;;  %v2435_v15 = vpop.f32.mrb[30].mxu1 }
 0x3b8   : > { %1804 = vst [vmem:[%s3375_s24 + $0xf0] sm:$0xff] %v3760_v11  ;;  %v1935_v12 = vsel %vm4018_vm4, %v3760_v11, -inf  ;;  %v3777_v32 = vadd.f32 %v2435_v15, %v3366_v48  ;;  %v1762_v24 = vpop.f32.mrb[31].mxu1 }
 0x3b9   : > { %1802 = vst [vmem:[%s3375_s24 + $0xe0] sm:$0xff] %v3769_v19  ;;  %v1933_v50 = vsel %vm1901_vm10, %v3769_v19, -inf  ;;  %v3785_v28 = vadd.f32 %v3366_v48, %v1762_v24  ;;  %v1963_v13 = vmax.f32 %v1959_v63, %v1935_v12 }
 0x3ba   : > { %1805 = vst [vmem:[%s3375_s24 + $0xf8] sm:$0xff] %v3777_v32  ;;  %v1936_v27 = vsel %vm4017_vm5, %v3777_v32, -inf  ;;  %v1961_v7 = vmax.f32 %v1957_v59, %v1933_v50 }
 0x3bb   : > { %v1964_v54 = vmax.f32 %v1960_v57, %v1936_v27  ;;  %1803 = vst [vmem:[%s3375_s24 + $0xe8] sm:$0xff] %v3785_v28  ;;  %v1934_v38 = vsel %vm1902_vm14, %v3785_v28, -inf }
 0x3bc   : > { %v1962_v48 = vmax.f32 %v1958_v21, %v1934_v38 }
 0x3bd   : > { %v1966_v15 = vmax.f32 %v1963_v13, %v1964_v54 }
 0x3be   : > { %v1965_v24 = vmax.f32 %v1961_v7, %v1962_v48 }
 0x3c0   : > { %v1967_v42 = vmax.f32 %v1965_v24, %v1966_v15 }
 0x3c2   : > { %v1968_v29 = vrot.slane %v1967_v42, 4 }
 0x3c4   : > { %v1969_v34 = vmax.f32 %v1967_v42, %v1968_v29 }
 0x3c6   : > { %v1970_v63 = vrot.slane %v1969_v34, 2 }
 0x3c8   : > { %v1971_v57 = vmax.f32 %v1969_v34, %v1970_v63 }
 0x3ca   : > { %v1972_v52 = vrot.slane %v1971_v57, 1 }
 0x3cc   : > { %v3807_v12 = vmax.f32 %v1971_v57, %v1972_v52 }
 0x3ce   : > { %2139 = vst [vmem:[%s352_s27] sm:$0xff] %v3807_v12  ;;  %v1974_v50 = vsub.f32 %v3382_v39, %v3807_v12  ;;  %v1975_v59 = vsub.f32 %v3392_v22, %v3807_v12  ;;  %v1976_v21 = vsub.f32 %v3379_v23, %v3807_v12  ;;  %v1977_v27 = vsub.f32 %v3387_v25, %v3807_v12 }
 0x3cf   : > { %v1978_v13 = vsub.f32 %v3402_v47, %v3807_v12  ;;  %v2002_v54 = vsub.f32 %v3769_v19, %v3807_v12  ;;  %v2003_v38 = vsub.f32 %v3785_v28, %v3807_v12  ;;  %v2004_v39 = vsub.f32 %v3760_v11, %v3807_v12 }
 0x3d0   : > { %v2005_v22 = vsub.f32 %v3777_v32, %v3807_v12  ;;  %v2006_v7 = vmul.f32 1.442695, %v1974_v50  ;;  %v2008_v23 = vmul.f32 1.442695, %v1975_v59  ;;  %v2010_v48 = vmul.f32 1.442695, %v1976_v21 }
 0x3d1   : > { %v1979_v25 = vsub.f32 %v3412_v44, %v3807_v12  ;;  %v2012_v15 = vmul.f32 1.442695, %v1977_v27  ;;  %v1980_v47 = vsub.f32 %v3399_v45, %v3807_v12  ;;  %v2014_v24 = vmul.f32 1.442695, %v1978_v13 }
 0x3d2   : > { %2515 = vpow2.f32 %v2006_v7  ;;  %v1981_v42 = vsub.f32 %v3407_v18, %v3807_v12  ;;  %v1982_v34 = vsub.f32 %v3422_v51, %v3807_v12  ;;  %v1983_v44 = vsub.f32 %v3432_v4, %v3807_v12  ;;  %v4079_v7 = vld [vmem:[#allocation9_spill] sm:$0xff]  ;;  %v4087_v51 = vld [vmem:[#allocation12_spill] sm:$0xff] }
 0x3d3   : > { %2517 = vpow2.f32 %v2008_v23  ;;  %v2016_v29 = vmul.f32 1.442695, %v1979_v25  ;;  %v2018_v63 = vmul.f32 1.442695, %v1980_v47  ;;  %v1984_v45 = vsub.f32 %v3419_v5, %v3807_v12 }
 0x3d4   : > { %2519 = vpow2.f32 %v2010_v48  ;;  %v2020_v57 = vmul.f32 1.442695, %v1981_v42  ;;  %v2022_v52 = vmul.f32 1.442695, %v1982_v34  ;;  %v1985_v18 = vsub.f32 %v3427_v55, %v3807_v12  ;;  %v4083_v34 = vld [vmem:[#allocation16_spill] sm:$0xff] }
 0x3d5   : > { %2521 = vpow2.f32 %v2012_v15  ;;  %v2024_v21 = vmul.f32 1.442695, %v1983_v44  ;;  %vm4080_vm5 = vcmp.lt.s32.totalorder %v4079_v7, 512  ;;  %v1986_v5 = vsub.f32 %v3442_v6, %v3807_v12  ;;  %v4081_v15 = vld [vmem:[#allocation11_spill] sm:$0xff] }
 0x3d6   : > { %2523 = vpow2.f32 %v2014_v24  ;;  %v2026_v48 = vmul.f32 1.442695, %v1984_v45  ;;  %vm4082_vm4 = vcmp.lt.s32.totalorder %v4081_v15, 512  ;;  %v1987_v24 = vsub.f32 %v3452_v35, %v3807_v12 }
 0x3d7   : > { %2525 = vpow2.f32 %v2016_v29  ;;  %v2028_v42 = vmul.f32 1.442695, %v1985_v18  ;;  %v1988_v6 = vsub.f32 %v3439_v33, %v3807_v12  ;;  %v1989_v35 = vsub.f32 %v3447_v9, %v3807_v12 }
 0x3d8   : > { %2527 = vpow2.f32 %v2018_v63  ;;  %v2032_v18 = vmul.f32 1.442695, %v1987_v24  ;;  %v1990_v33 = vsub.f32 %v3462_v1, %v3807_v12  ;;  %v1991_v9 = vsub.f32 %v3472_v20, %v3807_v12 }
 0x3d9   : > { %2529 = vpow2.f32 %v2020_v57  ;;  %v2030_v57 = vmul.f32 1.442695, %v1986_v5  ;;  %v2034_v7 = vmul.f32 1.442695, %v1988_v6  ;;  %v1992_v1 = vsub.f32 %v3459_v43, %v3807_v12 }
 0x3da   : > { %2531 = vpow2.f32 %v2022_v52  ;;  %v4085_v52 = vld [vmem:[#allocation10_spill] sm:$0xff]  ;;  %v1993_v20 = vsub.f32 %v3467_v58, %v3807_v12  ;;  %v2040_v6 = vmul.f32 1.442695, %v1991_v9  ;;  %v1994_v43 = vsub.f32 %v3482_v61, %v3807_v12 }
 0x3db   : > { %2533 = vpow2.f32 %v2024_v21  ;;  %v1995_v58 = vsub.f32 %v3492_v16, %v3807_v12  ;;  %v1996_v61 = vsub.f32 %v3479_v10, %v3807_v12  ;;  %v1997_v16 = vsub.f32 %v3487_v60, %v3807_v12 }
 0x3dc   : > { %v2516_v50 = vpop.eup %2515  ;;  %2535 = vpow2.f32 %v2026_v48  ;;  %v1998_v10 = vsub.f32 %v3502_v30, %v3807_v12  ;;  %v1999_v60 = vsub.f32 %v3512_v2, %v3807_v12  ;;  %v2000_v30 = vsub.f32 %v3499_v0, %v3807_v12 }
 0x3dd   : > { %v2518_v59 = vpop.eup %2517  ;;  %v2070_v27 = vsel %vm1873_vm1, %v2516_v50, 0.0  ;;  %vm4084_vm1 = vcmp.lt.s32.totalorder %v4083_v34, 512  ;;  %2537 = vpow2.f32 %v2028_v42  ;;  %v2038_v42 = vmul.f32 1.442695, %v1990_v33  ;;  %v4098_v33 = vld [vmem:[#allocation13_spill] sm:$0xff] }
 0x3de   : > { %v2520_v13 = vpop.eup %2519  ;;  %v2071_v4 = vsel %vm4080_vm5, %v2518_v59, 0.0  ;;  %vm4086_vm5 = vcmp.lt.s32.totalorder %v4085_v52, 512  ;;  %2539 = vpow2.f32 %v2030_v57  ;;  %v2001_v2 = vsub.f32 %v3507_v46, %v3807_v12 }
 0x3df   : > { %v2522_v23 = vpop.eup %2521  ;;  %v2102_v25 = vadd.f32 %v2071_v4, %v2070_v27  ;;  %v2072_v47 = vsel %vm4082_vm4, %v2520_v13, 0.0  ;;  %vm4088_vm4 = vcmp.lt.s32.totalorder %v4087_v51, 512  ;;  %2541 = vpow2.f32 %v2032_v18  ;;  %v4096_v18 = vld [vmem:[#allocation5_spill] sm:$0xff] }
 0x3e0   : > { %v2524_v55 = vpop.eup %2523  ;;  %v2073_v63 = vsel %vm4084_vm1, %v2522_v23, 0.0  ;;  %v4089_v23 = vld [vmem:[#allocation2_spill] sm:$0xff]  ;;  %2543 = vpow2.f32 %v2034_v7  ;;  %v2066_v19 = vmul.f32 1.442695, %v2004_v39  ;;  %v2068_v28 = vmul.f32 1.442695, %v2005_v22 }
 0x3e1   : > { %v2103_v29 = vadd.f32 %v2102_v25, %v2072_v47  ;;  %v2526_v44 = vpop.eup %2525  ;;  %v2074_v50 = vsel %vm4086_vm5, %v2524_v55, 0.0  ;;  %vm4090_vm1 = vcmp.lt.s32.totalorder %v4089_v23, 512  ;;  %v2036_v25 = vmul.f32 1.442695, %v1989_v35  ;;  %v4091_v47 = vld [vmem:[#allocation3_spill] sm:$0xff] }
 0x3e2   : > { %v2528_v59 = vpop.eup %2527  ;;  %v2075_v27 = vsel %vm4088_vm4, %v2526_v44, 0.0  ;;  %vm4092_vm5 = vcmp.lt.s32.totalorder %v4091_v47, 512  ;;  %v2046_v23 = vmul.f32 1.442695, %v1994_v43 }
 0x3e3   : > { %v2104_v45 = vadd.f32 %v2103_v29, %v2073_v63  ;;  %v2530_v13 = vpop.eup %2529  ;;  %v2076_v5 = vsel %vm4090_vm1, %v2528_v59, 0.0  ;;  %2545 = vpow2.f32 %v2036_v25  ;;  %v2042_v59 = vmul.f32 1.442695, %v1992_v1 }
 0x3e4   : > { %v2532_v48 = vpop.eup %2531  ;;  %v2077_v55 = vsel %vm4092_vm5, %v2530_v13, 0.0  ;;  %2547 = vpow2.f32 %v2038_v42  ;;  %vm4097_vm1 = vcmp.lt.s32.totalorder %v4096_v18, 512  ;;  %v2048_v25 = vmul.f32 1.442695, %v1995_v58 }
 0x3e5   : > { %v2105_v21 = vadd.f32 %v2104_v45, %v2074_v50  ;;  %v2534_v24 = vpop.eup %2533  ;;  %v2078_v63 = vsel %vm1881_vm9, %v2532_v48, 0.0  ;;  %v4094_v45 = vld [vmem:[#allocation6_spill] sm:$0xff]  ;;  %2549 = vpow2.f32 %v2040_v6  ;;  %vm4099_vm9 = vcmp.lt.s32.totalorder %v4098_v33, 512 }
 0x3e6   : > { %v2536_v44 = vpop.eup %2535  ;;  %vm4095_vm4 = vcmp.lt.s32.totalorder %v4094_v45, 512  ;;  %2551 = vpow2.f32 %v2042_v59  ;;  %v2050_v1 = vmul.f32 1.442695, %v1996_v61  ;;  %v2054_v45 = vmul.f32 1.442695, %v1998_v10 }
 0x3e7   : > { %v2106_v4 = vadd.f32 %v2105_v21, %v2075_v27  ;;  %v2079_v52 = vsel %vm4095_vm4, %v2534_v24, 0.0  ;;  %v2538_v50 = vpop.eup %2537  ;;  %v2080_v21 = vsel %vm4097_vm1, %v2536_v44, 0.0  ;;  %v2044_v27 = vmul.f32 1.442695, %v1993_v20  ;;  %v4102_v20 = vld [vmem:[#allocation14_spill] sm:$0xff] }
 0x3e8   : > { %v2540_v51 = vpop.eup %2539  ;;  %v2081_v7 = vsel %vm4099_vm9, %v2538_v50, 0.0  ;;  %v2056_v59 = vmul.f32 1.442695, %v1999_v60  ;;  %vm4106_vm5 = vcmp.lt.s32.totalorder %v3598_v31, 512  ;;  %vm4107_vm4 = vcmp.lt.s32.totalorder %v3605_v14, 512 }
 0x3e9   : > { %v2107_v15 = vadd.f32 %v2106_v4, %v2076_v5  ;;  %v2542_v4 = vpop.eup %2541  ;;  %v2082_v48 = vsel %vm1885_vm13, %v2540_v51, 0.0  ;;  %2553 = vpow2.f32 %v2044_v27  ;;  %vm4103_vm13 = vcmp.lt.s32.totalorder %v4102_v20, 512 }
 0x3ea   : > { %v2544_v9 = vpop.eup %2543  ;;  %2555 = vpow2.f32 %v2046_v23  ;;  %v2058_v51 = vmul.f32 1.442695, %v2000_v30  ;;  %v2064_v31 = vmul.f32 1.442695, %v2003_v38  ;;  %vm4108_vm1 = vcmp.lt.s32.totalorder %v3623_v37, 512 }
 0x3eb   : > { %v2108_v29 = vadd.f32 %v2107_v15, %v2077_v55  ;;  %v2083_v55 = vsel %vm1886_vm15, %v2542_v4, 0.0  ;;  %v2084_v53 = vsel %vm1887_vm12, %v2544_v9, 0.0  ;;  %2557 = vpow2.f32 %v2048_v25 }
 0x3ec   : > { %2559 = vpow2.f32 %v2050_v1  ;;  %vm4104_vm15 = vcmp.lt.s32.totalorder %v3602_v36, 512  ;;  %vm4105_vm12 = vcmp.lt.s32.totalorder %v3612_v41, 512  ;;  %v2060_v36 = vmul.f32 1.442695, %v2001_v2 }
 0x3ed   : > { %v2109_v57 = vadd.f32 %v2108_v29, %v2078_v63  ;;  %v2546_v24 = vpop.eup %2545  ;;  %v2052_v63 = vmul.f32 1.442695, %v1997_v16  ;;  %v2062_v41 = vmul.f32 1.442695, %v2002_v54 }
 0x3ee   : > { %v2548_v34 = vpop.eup %2547  ;;  %v2085_v6 = vsel %vm4103_vm13, %v2546_v24, 0.0 }
 0x3ef   : > { %v2110_v35 = vadd.f32 %v2109_v57, %v2079_v52  ;;  %v2550_v57 = vpop.eup %2549  ;;  %v2086_v50 = vsel %vm4104_vm15, %v2548_v34, 0.0  ;;  %2561 = vpow2.f32 %v2052_v63 }
 0x3f0   : > { %v2552_v43 = vpop.eup %2551  ;;  %v2087_v18 = vsel %vm4105_vm12, %v2550_v57, 0.0  ;;  %2563 = vpow2.f32 %v2054_v45 }
 0x3f1   : > { %v2111_v13 = vadd.f32 %v2110_v35, %v2080_v21  ;;  %v2088_v58 = vsel %vm4106_vm5, %v2552_v43, 0.0  ;;  %2565 = vpow2.f32 %v2056_v59 }
 0x3f2   : > { %2567 = vpow2.f32 %v2058_v51 }
 0x3f3   : > { %v2112_v5 = vadd.f32 %v2111_v13, %v2081_v7  ;;  %v2554_v21 = vpop.eup %2553  ;;  %2569 = vpow2.f32 %v2060_v36 }
 0x3f4   : > { %v2556_v27 = vpop.eup %2555  ;;  %v2089_v46 = vsel %vm4107_vm4, %v2554_v21, 0.0  ;;  %2571 = vpow2.f32 %v2062_v41 }
 0x3f5   : > { %v2113_v15 = vadd.f32 %v2112_v5, %v2082_v48  ;;  %v2558_v33 = vpop.eup %2557  ;;  %v2090_v4 = vsel %vm1893_vm6, %v2556_v27, 0.0  ;;  %2573 = vpow2.f32 %v2064_v31 }
 0x3f6   : > { %v2560_v61 = vpop.eup %2559  ;;  %v2091_v14 = vsel %vm1894_vm3, %v2558_v33, 0.0  ;;  %2575 = vpow2.f32 %v2066_v19  ;;  %vm4113_vm3 = vcmp.lt.s32.totalorder %v3728_v8, 512 }
 0x3f7   : > { %v2114_v42 = vadd.f32 %v2113_v15, %v2083_v55  ;;  %v2092_v56 = vsel %vm4108_vm1, %v2560_v61, 0.0  ;;  %2577 = vpow2.f32 %v2068_v28 }
 0x3f9   : > { %v2115_v44 = vadd.f32 %v2114_v42, %v2084_v53  ;;  %v2562_v5 = vpop.eup %2561 }
 0x3fa   : > { %v2564_v48 = vpop.eup %2563  ;;  %v2093_v40 = vsel %vm1896_vm0, %v2562_v5, 0.0  ;;  %vm4112_vm0 = vcmp.lt.s32.totalorder %v3719_v17, 512 }
 0x3fb   : > { %v2116_v52 = vadd.f32 %v2115_v44, %v2085_v6  ;;  %v2566_v9 = vpop.eup %2565  ;;  %v2094_v11 = vsel %vm1897_vm7, %v2564_v48, 0.0 }
 0x3fc   : > { %v2568_v39 = vpop.eup %2567  ;;  %v2095_v15 = vsel %vm1898_vm8, %v2566_v9, 0.0 }
 0x3fd   : > { %v2117_v35 = vadd.f32 %v2116_v52, %v2086_v50  ;;  %v2570_v47 = vpop.eup %2569  ;;  %v2096_v12 = vsel %vm1899_vm2, %v2568_v39, 0.0 }
 0x3fe   : > { %v2572_v22 = vpop.eup %2571  ;;  %v2097_v10 = vsel %vm1900_vm11, %v2570_v47, 0.0 }
 0x3ff   : > { %v2118_v0 = vadd.f32 %v2117_v35, %v2087_v18  ;;  %v2574_v1 = vpop.eup %2573  ;;  %v2098_v26 = vsel %vm1901_vm10, %v2572_v22, 0.0 }
 0x400   : > { %v2576_v29 = vpop.eup %2575  ;;  %v2099_v34 = vsel %vm1902_vm14, %v2574_v1, 0.0 }
 0x401   : > { %v2119_v13 = vadd.f32 %v2118_v0, %v2088_v58  ;;  %v2578_v60 = vpop.eup %2577  ;;  %v2100_v44 = vsel %vm4112_vm0, %v2576_v29, 0.0 }
 0x402   : > { %v2101_v6 = vsel %vm4113_vm3, %v2578_v60, 0.0 }
 0x403   : > { %v2120_v7 = vadd.f32 %v2119_v13, %v2089_v46 }
 0x405   : > { %v2121_v23 = vadd.f32 %v2120_v7, %v2090_v4 }
 0x407   : > { %v2122_v54 = vadd.f32 %v2121_v23, %v2091_v14 }
 0x409   : > { %v2123_v38 = vadd.f32 %v2122_v54, %v2092_v56 }
 0x40b   : > { %v2124_v16 = vadd.f32 %v2123_v38, %v2093_v40 }
 0x40d   : > { %v2125_v37 = vadd.f32 %v2124_v16, %v2094_v11 }
 0x40f   : > { %v2126_v55 = vadd.f32 %v2125_v37, %v2095_v15 }
 0x411   : > { %v2127_v3 = vadd.f32 %v2126_v55, %v2096_v12 }
 0x413   : > { %v2128_v42 = vadd.f32 %v2127_v3, %v2097_v10 }
 0x415   : > { %v2129_v53 = vadd.f32 %v2128_v42, %v2098_v26 }
 0x417   : > { %v2130_v63 = vadd.f32 %v2129_v53, %v2099_v34 }
 0x419   : > { %v2131_v20 = vadd.f32 %v2130_v63, %v2100_v44 }
 0x41b   : > { %v2132_v57 = vadd.f32 %v2131_v20, %v2101_v6 }
 0x41d   : > { %v2133_v30 = vrot.slane %v2132_v57, 4 }
 0x41f   : > { %v2134_v45 = vadd.f32 %v2133_v30, %v2132_v57 }
 0x421   : > { %v2135_v62 = vrot.slane %v2134_v45, 2 }
 0x423   : > { %v2136_v52 = vadd.f32 %v2135_v62, %v2134_v45 }
 0x425   : > { %v2137_v50 = vrot.slane %v2136_v52, 1 }
 0x427   : > { %v2138_v49 = vadd.f32 %v2137_v50, %v2136_v52 }
 0x429   : > { %2140 = vst [vmem:[%s356_s13] sm:$0xff] %v2138_v49 }
 0x42a PF: > { %s20_s30 = sadd.s32 1, %s2585_s30  }
 0x42b   : > { %p17_p5 = scmp.ge.s32.totalorder %s20_s30, 4  }
 0x42d   :  { %19 = sbr.rel (!%p17_p5) target bundleno = 1 (0x1), region = 102 }

</bundles_post_ra>
